<compile_context>
chip_gen: v6e
topology: v6e:2x2x1
jax: 0.10.0
libtpu: 0.0.40
codegen_flags: <defaults>
</compile_context>

<pallas_src>
import functools

import jax
import jax.numpy as jnp
from jax.experimental import pallas as pl
from jax.experimental.pallas import tpu as pltpu

# ----------------------------- model hyper-parameters --------------------------
IN_FEATURES = 16
OUT_FEATURES = 8
WIDTH = 32
NUM_BLOCKS = 2            # num_basic_dropout_blocks
DROPTOL = 0.5             # dropout probability p

NUM_HIDDEN_LINEARS = 1 + 2 * NUM_BLOCKS        # linear1 + 2 per BasicDropoutBlock = 5
NUM_DROPOUTS = NUM_HIDDEN_LINEARS + 1          # drop1 + one dropout after every hidden linear

# keep  <=>  int32 uniform bits >= thresh ;  P(keep) = 1 - p
_DROP_THRESH_I32 = int(round(DROPTOL * 2.0 ** 32)) - 2 ** 31
_DROP_SCALE = float(1.0 / (1.0 - DROPTOL))


# --------------------------------- kernel --------------------------------------
def _net_kernel(bits_ref,                 # (ND, TILE_B, W)   int32
                x_ref,                    # (TILE_B, IN)      f32
                w_in_ref, b_in_ref,       # (IN, W) bf16, (1, W) f32
                hw_ref, hb_ref,           # (NH, W, W) bf16, (NH, 1, W) f32
                w_out_ref, b_out_ref,     # (W, OUT) bf16, (1, OUT) f32
                o_ref,                    # (TILE_B, OUT)     f32
                *, num_hidden, keep_thresh, scale):

    def dense(h, w, b):
        # bf16 MXU inputs, f32 accumulation; bias add in f32.
        return jnp.dot(h.astype(jnp.bfloat16), w,
                       preferred_element_type=jnp.float32) + b

    def dropout_then_relu(h, i):
        # relu(dropout(h)) fused into a single select (scale > 0).
        keep = bits_ref[i] >= keep_thresh
        return jnp.where(jnp.logical_and(keep, h > 0.0), h * scale, 0.0)

    # linear_input -> drop1 -> activate1
    h = dense(x_ref[...], w_in_ref[...], b_in_ref[...])
    h = dropout_then_relu(h, 0)

    # linear1 -> drop2 -> blocks(relu -> linear -> drop ...) -> activate_post_blocks
    # Every hidden linear in this net is followed by a dropout and then a ReLU.
    for i in range(num_hidden):
        h = dense(h, hw_ref[i], hb_ref[i])
        h = dropout_then_relu(h, i + 1)

    # linear_output
    o_ref[...] = dense(h, w_out_ref[...], b_out_ref[...]).astype(o_ref.dtype)


# -------------------------------- wrapper ---------------------------------------
def make_dropout_bits(key, batch):
    """One batched draw of uniform bits for all NUM_DROPOUTS dropout layers."""
    u = jax.random.bits(key, (NUM_DROPOUTS, batch, WIDTH), dtype=jnp.uint32)
    return jax.lax.bitcast_convert_type(u, jnp.int32)


def standard_dropout_net(x, params, dropout_bits, *, tile_b=128):
    """x: [B, IN_FEATURES] f32.  dropout_bits: [NUM_DROPOUTS, B, WIDTH] int32."""
    batch = x.shape[0]
    tile_b = min(tile_b, ((batch + 7) // 8) * 8)          # sublane-multiple tile
    b_pad = ((batch + tile_b - 1) // tile_b) * tile_b
    if b_pad != batch:
        x = jnp.pad(x, ((0, b_pad - batch), (0, 0)))
        dropout_bits = jnp.pad(dropout_bits, ((0, 0), (0, b_pad - batch), (0, 0)))

    kernel = functools.partial(_net_kernel,
                               num_hidden=NUM_HIDDEN_LINEARS,
                               keep_thresh=_DROP_THRESH_I32,
                               scale=_DROP_SCALE)

    out = pl.pallas_call(
        kernel,
        out_shape=jax.ShapeDtypeStruct((b_pad, OUT_FEATURES), jnp.float32),
        grid=(b_pad // tile_b,),
        in_specs=[
            # streamed per batch tile
            pl.BlockSpec((NUM_DROPOUTS, tile_b, WIDTH), lambda i: (0, i, 0)),
            pl.BlockSpec((tile_b, IN_FEATURES), lambda i: (i, 0)),
            # weights/biases: constant index maps -> VMEM-resident across grid steps
            pl.BlockSpec((IN_FEATURES, WIDTH), lambda i: (0, 0)),
            pl.BlockSpec((1, WIDTH), lambda i: (0, 0)),
            pl.BlockSpec((NUM_HIDDEN_LINEARS, WIDTH, WIDTH), lambda i: (0, 0, 0)),
            pl.BlockSpec((NUM_HIDDEN_LINEARS, 1, WIDTH), lambda i: (0, 0, 0)),
            pl.BlockSpec((WIDTH, OUT_FEATURES), lambda i: (0, 0)),
            pl.BlockSpec((1, OUT_FEATURES), lambda i: (0, 0)),
        ],
        out_specs=pl.BlockSpec((tile_b, OUT_FEATURES), lambda i: (i, 0)),
        compiler_params=pltpu.CompilerParams(
            dimension_semantics=("parallel",)),    # independent batch tiles
    )(dropout_bits, x,
      params["w_in"], params["b_in"],
      params["hw"], params["hb"],
      params["w_out"], params["b_out"])
    return out[:batch]


# ----------------------------- params & reference -------------------------------
def init_params(key):
    """torch.nn.Linear-style U(-1/sqrt(fan_in), +) init; weights pre-transposed to
    (in, out) and stored bf16 for the MXU; biases stay f32."""
    ks = jax.random.split(key, 2 * (2 + NUM_HIDDEN_LINEARS))

    def lin(kw, kb, fan_in, fan_out):
        bound = 1.0 / float(fan_in) ** 0.5
        w = jax.random.uniform(kw, (fan_in, fan_out), jnp.float32, -bound, bound)
        b = jax.random.uniform(kb, (1, fan_out), jnp.float32, -bound, bound)
        return w.astype(jnp.bfloat16), b

    w_in, b_in = lin(ks[0], ks[1], IN_FEATURES, WIDTH)
    hws, hbs = [], []
    for i in range(NUM_HIDDEN_LINEARS):
        w, b = lin(ks[2 + 2 * i], ks[3 + 2 * i], WIDTH, WIDTH)
        hws.append(w)
        hbs.append(b)
    w_out, b_out = lin(ks[2 + 2 * NUM_HIDDEN_LINEARS],
                       ks[3 + 2 * NUM_HIDDEN_LINEARS], WIDTH, OUT_FEATURES)
    return {"w_in": w_in, "b_in": b_in,
            "hw": jnp.stack(hws, 0), "hb": jnp.stack(hbs, 0),
            "w_out": w_out, "b_out": b_out}


def reference_forward(x, params, dropout_bits):
    """Pure-JAX reference with identical bf16/dropout semantics."""
    def dense(h, w, b):
        return jnp.dot(h.astype(jnp.bfloat16), w,
                       preferred_element_type=jnp.float32) + b

    def drop_relu(h, i):
        keep = dropout_bits[i] >= _DROP_THRESH_I32
        return jnp.where(jnp.logical_and(keep, h > 0.0), h * _DROP_SCALE, 0.0)

    h = dense(x, params["w_in"], params["b_in"])
    h = drop_relu(h, 0)
    for i in range(NUM_HIDDEN_LINEARS):
        h = dense(h, params["hw"][i], params["hb"][i])
        h = drop_relu(h, i + 1)
    return dense(h, params["w_out"], params["b_out"])


# ----------------------------------- main ----------------------------------------
if __name__ == "__main__":
    key = jax.random.PRNGKey(0)
    k_x, k_p, k_d = jax.random.split(key, 3)

    BATCH = 256                                   # grid = 2 tiles of 128 rows
    x = jax.random.normal(k_x, (BATCH, IN_FEATURES), dtype=jnp.float32)
    params = init_params(k_p)
    # New bits every forward call (training step) -> fresh dropout masks per tile/row.
    bits = make_dropout_bits(k_d, BATCH)

    y = standard_dropout_net(x, params, bits, tile_b=128)
    jax.block_until_ready(y)
    assert y.shape == (BATCH, OUT_FEATURES), y.shape

    y_ref = reference_forward(x, params, bits)
    assert bool(jnp.all(jnp.isfinite(y)))
    assert jnp.allclose(y, y_ref, rtol=1e-3, atol=1e-3), \
        float(jnp.max(jnp.abs(y - y_ref)))

    print("KERNEL_OK")
</pallas_src>

<mosaic_0001>
module attributes {stable_mosaic.version = 11 : i64} {
  func.func @_net_kernel(%arg0: i32, %arg1: memref<6x128x32xi32, #tpu.memory_space<vmem>>, %arg2: memref<128x16xf32, #tpu.memory_space<vmem>>, %arg3: memref<16x32xbf16, #tpu.memory_space<vmem>>, %arg4: memref<1x32xf32, #tpu.memory_space<vmem>>, %arg5: memref<5x32x32xbf16, #tpu.memory_space<vmem>>, %arg6: memref<5x1x32xf32, #tpu.memory_space<vmem>>, %arg7: memref<32x8xbf16, #tpu.memory_space<vmem>>, %arg8: memref<1x8xf32, #tpu.memory_space<vmem>>, %arg9: memref<128x8xf32, #tpu.memory_space<vmem>>) attributes {dimension_semantics = [#tpu.dimension_semantics<parallel>], iteration_bounds = array<i64: 2>, scalar_prefetch = 0 : i64, scratch_operands = 0 : i64, tpu.core_type = #tpu.core_type<tc>, window_params = [{transform_indices = @transform_0, window_bounds = array<i64: 6, 128, 32>}, {transform_indices = @transform_1, window_bounds = array<i64: 128, 16>}, {pipeline_mode = #tpu.pipeline_mode<synchronous>, transform_indices = @transform_2, window_bounds = array<i64: 16, 32>}, {pipeline_mode = #tpu.pipeline_mode<synchronous>, transform_indices = @transform_3, window_bounds = array<i64: 1, 32>}, {pipeline_mode = #tpu.pipeline_mode<synchronous>, transform_indices = @transform_4, window_bounds = array<i64: 5, 32, 32>}, {pipeline_mode = #tpu.pipeline_mode<synchronous>, transform_indices = @transform_5, window_bounds = array<i64: 5, 1, 32>}, {pipeline_mode = #tpu.pipeline_mode<synchronous>, transform_indices = @transform_6, window_bounds = array<i64: 32, 8>}, {pipeline_mode = #tpu.pipeline_mode<synchronous>, transform_indices = @transform_7, window_bounds = array<i64: 1, 8>}, {transform_indices = @transform_8, window_bounds = array<i64: 128, 8>}]} {
    %c0 = arith.constant 0 : index
    %c0_0 = arith.constant 0 : index
    %0 = vector.load %arg2[%c0, %c0_0] : memref<128x16xf32, #tpu.memory_space<vmem>>, vector<128x16xf32>
    %c0_1 = arith.constant 0 : index
    %c0_2 = arith.constant 0 : index
    %1 = vector.load %arg3[%c0_1, %c0_2] : memref<16x32xbf16, #tpu.memory_space<vmem>>, vector<16x32xbf16>
    %c0_3 = arith.constant 0 : index
    %c0_4 = arith.constant 0 : index
    %2 = vector.load %arg4[%c0_3, %c0_4] : memref<1x32xf32, #tpu.memory_space<vmem>>, vector<1x32xf32>
    %3 = arith.truncf %0 : vector<128x16xf32> to vector<128x16xbf16>
    %cst = arith.constant dense<0.000000e+00> : vector<128x32xf32>
    %4 = tpu.matmul %3, %1, %cst {dimension_numbers = #tpu.dot_dimension_numbers<[1], [0], [0], [1], [0, 0, 1, 1], [], []>} : vector<128x16xbf16>, vector<16x32xbf16>, vector<128x32xf32> -> vector<128x32xf32>
    %5 = vector.broadcast %2 : vector<1x32xf32> to vector<128x32xf32>
    %6 = arith.addf %4, %5 : vector<128x32xf32>
    %c0_5 = arith.constant 0 : index
    %c0_6 = arith.constant 0 : index
    %c0_7 = arith.constant 0 : index
    %7 = vector.load %arg1[%c0_5, %c0_6, %c0_7] : memref<6x128x32xi32, #tpu.memory_space<vmem>>, vector<1x128x32xi32>
    %8 = vector.shape_cast %7 : vector<1x128x32xi32> to vector<128x32xi32>
    %c0_i32 = arith.constant 0 : i32
    %9 = vector.broadcast %c0_i32 : i32 to vector<128x32xi32>
    %10 = arith.cmpi sge, %8, %9 : vector<128x32xi32>
    %cst_8 = arith.constant 0.000000e+00 : f32
    %11 = vector.broadcast %cst_8 : f32 to vector<128x32xf32>
    %12 = arith.cmpf ogt, %6, %11 : vector<128x32xf32>
    %13 = arith.andi %10, %12 : vector<128x32xi1>
    %cst_9 = arith.constant 2.000000e+00 : f32
    %14 = vector.broadcast %cst_9 : f32 to vector<128x32xf32>
    %15 = arith.mulf %6, %14 : vector<128x32xf32>
    %cst_10 = arith.constant 0.000000e+00 : f32
    %16 = vector.broadcast %cst_10 : f32 to vector<128x32xf32>
    %17 = arith.select %13, %15, %16 : vector<128x32xi1>, vector<128x32xf32>
    %c0_11 = arith.constant 0 : index
    %c0_12 = arith.constant 0 : index
    %c0_13 = arith.constant 0 : index
    %18 = vector.load %arg5[%c0_11, %c0_12, %c0_13] : memref<5x32x32xbf16, #tpu.memory_space<vmem>>, vector<1x32x32xbf16>
    %19 = vector.shape_cast %18 : vector<1x32x32xbf16> to vector<32x32xbf16>
    %c0_14 = arith.constant 0 : index
    %c0_15 = arith.constant 0 : index
    %c0_16 = arith.constant 0 : index
    %20 = vector.load %arg6[%c0_14, %c0_15, %c0_16] : memref<5x1x32xf32, #tpu.memory_space<vmem>>, vector<1x1x32xf32>
    %21 = vector.shape_cast %20 : vector<1x1x32xf32> to vector<1x32xf32>
    %22 = arith.truncf %17 : vector<128x32xf32> to vector<128x32xbf16>
    %cst_17 = arith.constant dense<0.000000e+00> : vector<128x32xf32>
    %23 = tpu.matmul %22, %19, %cst_17 {dimension_numbers = #tpu.dot_dimension_numbers<[1], [0], [0], [1], [0, 0, 1, 1], [], []>} : vector<128x32xbf16>, vector<32x32xbf16>, vector<128x32xf32> -> vector<128x32xf32>
    %24 = vector.broadcast %21 : vector<1x32xf32> to vector<128x32xf32>
    %25 = arith.addf %23, %24 : vector<128x32xf32>
    %c1 = arith.constant 1 : index
    %c0_18 = arith.constant 0 : index
    %c0_19 = arith.constant 0 : index
    %26 = vector.load %arg1[%c1, %c0_18, %c0_19] : memref<6x128x32xi32, #tpu.memory_space<vmem>>, vector<1x128x32xi32>
    %27 = vector.shape_cast %26 : vector<1x128x32xi32> to vector<128x32xi32>
    %c0_i32_20 = arith.constant 0 : i32
    %28 = vector.broadcast %c0_i32_20 : i32 to vector<128x32xi32>
    %29 = arith.cmpi sge, %27, %28 : vector<128x32xi32>
    %cst_21 = arith.constant 0.000000e+00 : f32
    %30 = vector.broadcast %cst_21 : f32 to vector<128x32xf32>
    %31 = arith.cmpf ogt, %25, %30 : vector<128x32xf32>
    %32 = arith.andi %29, %31 : vector<128x32xi1>
    %cst_22 = arith.constant 2.000000e+00 : f32
    %33 = vector.broadcast %cst_22 : f32 to vector<128x32xf32>
    %34 = arith.mulf %25, %33 : vector<128x32xf32>
    %cst_23 = arith.constant 0.000000e+00 : f32
    %35 = vector.broadcast %cst_23 : f32 to vector<128x32xf32>
    %36 = arith.select %32, %34, %35 : vector<128x32xi1>, vector<128x32xf32>
    %c1_24 = arith.constant 1 : index
    %c0_25 = arith.constant 0 : index
    %c0_26 = arith.constant 0 : index
    %37 = vector.load %arg5[%c1_24, %c0_25, %c0_26] : memref<5x32x32xbf16, #tpu.memory_space<vmem>>, vector<1x32x32xbf16>
    %38 = vector.shape_cast %37 : vector<1x32x32xbf16> to vector<32x32xbf16>
    %c1_27 = arith.constant 1 : index
    %c0_28 = arith.constant 0 : index
    %c0_29 = arith.constant 0 : index
    %39 = vector.load %arg6[%c1_27, %c0_28, %c0_29] : memref<5x1x32xf32, #tpu.memory_space<vmem>>, vector<1x1x32xf32>
    %40 = vector.shape_cast %39 : vector<1x1x32xf32> to vector<1x32xf32>
    %41 = arith.truncf %36 : vector<128x32xf32> to vector<128x32xbf16>
    %cst_30 = arith.constant dense<0.000000e+00> : vector<128x32xf32>
    %42 = tpu.matmul %41, %38, %cst_30 {dimension_numbers = #tpu.dot_dimension_numbers<[1], [0], [0], [1], [0, 0, 1, 1], [], []>} : vector<128x32xbf16>, vector<32x32xbf16>, vector<128x32xf32> -> vector<128x32xf32>
    %43 = vector.broadcast %40 : vector<1x32xf32> to vector<128x32xf32>
    %44 = arith.addf %42, %43 : vector<128x32xf32>
    %c2 = arith.constant 2 : index
    %c0_31 = arith.constant 0 : index
    %c0_32 = arith.constant 0 : index
    %45 = vector.load %arg1[%c2, %c0_31, %c0_32] : memref<6x128x32xi32, #tpu.memory_space<vmem>>, vector<1x128x32xi32>
    %46 = vector.shape_cast %45 : vector<1x128x32xi32> to vector<128x32xi32>
    %c0_i32_33 = arith.constant 0 : i32
    %47 = vector.broadcast %c0_i32_33 : i32 to vector<128x32xi32>
    %48 = arith.cmpi sge, %46, %47 : vector<128x32xi32>
    %cst_34 = arith.constant 0.000000e+00 : f32
    %49 = vector.broadcast %cst_34 : f32 to vector<128x32xf32>
    %50 = arith.cmpf ogt, %44, %49 : vector<128x32xf32>
    %51 = arith.andi %48, %50 : vector<128x32xi1>
    %cst_35 = arith.constant 2.000000e+00 : f32
    %52 = vector.broadcast %cst_35 : f32 to vector<128x32xf32>
    %53 = arith.mulf %44, %52 : vector<128x32xf32>
    %cst_36 = arith.constant 0.000000e+00 : f32
    %54 = vector.broadcast %cst_36 : f32 to vector<128x32xf32>
    %55 = arith.select %51, %53, %54 : vector<128x32xi1>, vector<128x32xf32>
    %c2_37 = arith.constant 2 : index
    %c0_38 = arith.constant 0 : index
    %c0_39 = arith.constant 0 : index
    %56 = vector.load %arg5[%c2_37, %c0_38, %c0_39] : memref<5x32x32xbf16, #tpu.memory_space<vmem>>, vector<1x32x32xbf16>
    %57 = vector.shape_cast %56 : vector<1x32x32xbf16> to vector<32x32xbf16>
    %c2_40 = arith.constant 2 : index
    %c0_41 = arith.constant 0 : index
    %c0_42 = arith.constant 0 : index
    %58 = vector.load %arg6[%c2_40, %c0_41, %c0_42] : memref<5x1x32xf32, #tpu.memory_space<vmem>>, vector<1x1x32xf32>
    %59 = vector.shape_cast %58 : vector<1x1x32xf32> to vector<1x32xf32>
    %60 = arith.truncf %55 : vector<128x32xf32> to vector<128x32xbf16>
    %cst_43 = arith.constant dense<0.000000e+00> : vector<128x32xf32>
    %61 = tpu.matmul %60, %57, %cst_43 {dimension_numbers = #tpu.dot_dimension_numbers<[1], [0], [0], [1], [0, 0, 1, 1], [], []>} : vector<128x32xbf16>, vector<32x32xbf16>, vector<128x32xf32> -> vector<128x32xf32>
    %62 = vector.broadcast %59 : vector<1x32xf32> to vector<128x32xf32>
    %63 = arith.addf %61, %62 : vector<128x32xf32>
    %c3 = arith.constant 3 : index
    %c0_44 = arith.constant 0 : index
    %c0_45 = arith.constant 0 : index
    %64 = vector.load %arg1[%c3, %c0_44, %c0_45] : memref<6x128x32xi32, #tpu.memory_space<vmem>>, vector<1x128x32xi32>
    %65 = vector.shape_cast %64 : vector<1x128x32xi32> to vector<128x32xi32>
    %c0_i32_46 = arith.constant 0 : i32
    %66 = vector.broadcast %c0_i32_46 : i32 to vector<128x32xi32>
    %67 = arith.cmpi sge, %65, %66 : vector<128x32xi32>
    %cst_47 = arith.constant 0.000000e+00 : f32
    %68 = vector.broadcast %cst_47 : f32 to vector<128x32xf32>
    %69 = arith.cmpf ogt, %63, %68 : vector<128x32xf32>
    %70 = arith.andi %67, %69 : vector<128x32xi1>
    %cst_48 = arith.constant 2.000000e+00 : f32
    %71 = vector.broadcast %cst_48 : f32 to vector<128x32xf32>
    %72 = arith.mulf %63, %71 : vector<128x32xf32>
    %cst_49 = arith.constant 0.000000e+00 : f32
    %73 = vector.broadcast %cst_49 : f32 to vector<128x32xf32>
    %74 = arith.select %70, %72, %73 : vector<128x32xi1>, vector<128x32xf32>
    %c3_50 = arith.constant 3 : index
    %c0_51 = arith.constant 0 : index
    %c0_52 = arith.constant 0 : index
    %75 = vector.load %arg5[%c3_50, %c0_51, %c0_52] : memref<5x32x32xbf16, #tpu.memory_space<vmem>>, vector<1x32x32xbf16>
    %76 = vector.shape_cast %75 : vector<1x32x32xbf16> to vector<32x32xbf16>
    %c3_53 = arith.constant 3 : index
    %c0_54 = arith.constant 0 : index
    %c0_55 = arith.constant 0 : index
    %77 = vector.load %arg6[%c3_53, %c0_54, %c0_55] : memref<5x1x32xf32, #tpu.memory_space<vmem>>, vector<1x1x32xf32>
    %78 = vector.shape_cast %77 : vector<1x1x32xf32> to vector<1x32xf32>
    %79 = arith.truncf %74 : vector<128x32xf32> to vector<128x32xbf16>
    %cst_56 = arith.constant dense<0.000000e+00> : vector<128x32xf32>
    %80 = tpu.matmul %79, %76, %cst_56 {dimension_numbers = #tpu.dot_dimension_numbers<[1], [0], [0], [1], [0, 0, 1, 1], [], []>} : vector<128x32xbf16>, vector<32x32xbf16>, vector<128x32xf32> -> vector<128x32xf32>
    %81 = vector.broadcast %78 : vector<1x32xf32> to vector<128x32xf32>
    %82 = arith.addf %80, %81 : vector<128x32xf32>
    %c4 = arith.constant 4 : index
    %c0_57 = arith.constant 0 : index
    %c0_58 = arith.constant 0 : index
    %83 = vector.load %arg1[%c4, %c0_57, %c0_58] : memref<6x128x32xi32, #tpu.memory_space<vmem>>, vector<1x128x32xi32>
    %84 = vector.shape_cast %83 : vector<1x128x32xi32> to vector<128x32xi32>
    %c0_i32_59 = arith.constant 0 : i32
    %85 = vector.broadcast %c0_i32_59 : i32 to vector<128x32xi32>
    %86 = arith.cmpi sge, %84, %85 : vector<128x32xi32>
    %cst_60 = arith.constant 0.000000e+00 : f32
    %87 = vector.broadcast %cst_60 : f32 to vector<128x32xf32>
    %88 = arith.cmpf ogt, %82, %87 : vector<128x32xf32>
    %89 = arith.andi %86, %88 : vector<128x32xi1>
    %cst_61 = arith.constant 2.000000e+00 : f32
    %90 = vector.broadcast %cst_61 : f32 to vector<128x32xf32>
    %91 = arith.mulf %82, %90 : vector<128x32xf32>
    %cst_62 = arith.constant 0.000000e+00 : f32
    %92 = vector.broadcast %cst_62 : f32 to vector<128x32xf32>
    %93 = arith.select %89, %91, %92 : vector<128x32xi1>, vector<128x32xf32>
    %c4_63 = arith.constant 4 : index
    %c0_64 = arith.constant 0 : index
    %c0_65 = arith.constant 0 : index
    %94 = vector.load %arg5[%c4_63, %c0_64, %c0_65] : memref<5x32x32xbf16, #tpu.memory_space<vmem>>, vector<1x32x32xbf16>
    %95 = vector.shape_cast %94 : vector<1x32x32xbf16> to vector<32x32xbf16>
    %c4_66 = arith.constant 4 : index
    %c0_67 = arith.constant 0 : index
    %c0_68 = arith.constant 0 : index
    %96 = vector.load %arg6[%c4_66, %c0_67, %c0_68] : memref<5x1x32xf32, #tpu.memory_space<vmem>>, vector<1x1x32xf32>
    %97 = vector.shape_cast %96 : vector<1x1x32xf32> to vector<1x32xf32>
    %98 = arith.truncf %93 : vector<128x32xf32> to vector<128x32xbf16>
    %cst_69 = arith.constant dense<0.000000e+00> : vector<128x32xf32>
    %99 = tpu.matmul %98, %95, %cst_69 {dimension_numbers = #tpu.dot_dimension_numbers<[1], [0], [0], [1], [0, 0, 1, 1], [], []>} : vector<128x32xbf16>, vector<32x32xbf16>, vector<128x32xf32> -> vector<128x32xf32>
    %100 = vector.broadcast %97 : vector<1x32xf32> to vector<128x32xf32>
    %101 = arith.addf %99, %100 : vector<128x32xf32>
    %c5 = arith.constant 5 : index
    %c0_70 = arith.constant 0 : index
    %c0_71 = arith.constant 0 : index
    %102 = vector.load %arg1[%c5, %c0_70, %c0_71] : memref<6x128x32xi32, #tpu.memory_space<vmem>>, vector<1x128x32xi32>
    %103 = vector.shape_cast %102 : vector<1x128x32xi32> to vector<128x32xi32>
    %c0_i32_72 = arith.constant 0 : i32
    %104 = vector.broadcast %c0_i32_72 : i32 to vector<128x32xi32>
    %105 = arith.cmpi sge, %103, %104 : vector<128x32xi32>
    %cst_73 = arith.constant 0.000000e+00 : f32
    %106 = vector.broadcast %cst_73 : f32 to vector<128x32xf32>
    %107 = arith.cmpf ogt, %101, %106 : vector<128x32xf32>
    %108 = arith.andi %105, %107 : vector<128x32xi1>
    %cst_74 = arith.constant 2.000000e+00 : f32
    %109 = vector.broadcast %cst_74 : f32 to vector<128x32xf32>
    %110 = arith.mulf %101, %109 : vector<128x32xf32>
    %cst_75 = arith.constant 0.000000e+00 : f32
    %111 = vector.broadcast %cst_75 : f32 to vector<128x32xf32>
    %112 = arith.select %108, %110, %111 : vector<128x32xi1>, vector<128x32xf32>
    %c0_76 = arith.constant 0 : index
    %c0_77 = arith.constant 0 : index
    %113 = vector.load %arg7[%c0_76, %c0_77] : memref<32x8xbf16, #tpu.memory_space<vmem>>, vector<32x8xbf16>
    %c0_78 = arith.constant 0 : index
    %c0_79 = arith.constant 0 : index
    %114 = vector.load %arg8[%c0_78, %c0_79] : memref<1x8xf32, #tpu.memory_space<vmem>>, vector<1x8xf32>
    %115 = arith.truncf %112 : vector<128x32xf32> to vector<128x32xbf16>
    %cst_80 = arith.constant dense<0.000000e+00> : vector<128x8xf32>
    %116 = tpu.matmul %115, %113, %cst_80 {dimension_numbers = #tpu.dot_dimension_numbers<[1], [0], [0], [1], [0, 0, 1, 1], [], []>} : vector<128x32xbf16>, vector<32x8xbf16>, vector<128x8xf32> -> vector<128x8xf32>
    %117 = vector.broadcast %114 : vector<1x8xf32> to vector<128x8xf32>
    %118 = arith.addf %116, %117 : vector<128x8xf32>
    %c0_81 = arith.constant 0 : index
    %c0_82 = arith.constant 0 : index
    %119 = vector.load %arg9[%c0_81, %c0_82] : memref<128x8xf32, #tpu.memory_space<vmem>>, vector<128x8xf32>
    tpu.vector_store %arg9[%c0_81, %c0_82], %118 {strides = array<i32>} : memref<128x8xf32, #tpu.memory_space<vmem>>, vector<128x8xf32>,
    return
  }
  func.func @transform_0(%arg0: i32) -> (i32, i32, i32) {
    %c0_i32 = arith.constant 0 : i32
    %c0_i32_0 = arith.constant 0 : i32
    %c0_i32_1 = arith.constant 0 : i32
    return %c0_i32, %arg0, %c0_i32_0 : i32, i32, i32
  }
  func.func @transform_1(%arg0: i32) -> (i32, i32) {
    %c0_i32 = arith.constant 0 : i32
    %c0_i32_0 = arith.constant 0 : i32
    return %arg0, %c0_i32 : i32, i32
  }
  func.func @transform_2(%arg0: i32) -> (i32, i32) {
    %c0_i32 = arith.constant 0 : i32
    %c0_i32_0 = arith.constant 0 : i32
    %c0_i32_1 = arith.constant 0 : i32
    return %c0_i32, %c0_i32_0 : i32, i32
  }
  func.func @transform_3(%arg0: i32) -> (i32, i32) {
    %c0_i32 = arith.constant 0 : i32
    %c0_i32_0 = arith.constant 0 : i32
    %c0_i32_1 = arith.constant 0 : i32
    return %c0_i32, %c0_i32_0 : i32, i32
  }
  func.func @transform_4(%arg0: i32) -> (i32, i32, i32) {
    %c0_i32 = arith.constant 0 : i32
    %c0_i32_0 = arith.constant 0 : i32
    %c0_i32_1 = arith.constant 0 : i32
    %c0_i32_2 = arith.constant 0 : i32
    return %c0_i32, %c0_i32_0, %c0_i32_1 : i32, i32, i32
  }
  func.func @transform_5(%arg0: i32) -> (i32, i32, i32) {
    %c0_i32 = arith.constant 0 : i32
    %c0_i32_0 = arith.constant 0 : i32
    %c0_i32_1 = arith.constant 0 : i32
    %c0_i32_2 = arith.constant 0 : i32
    return %c0_i32, %c0_i32_0, %c0_i32_1 : i32, i32, i32
  }
  func.func @transform_6(%arg0: i32) -> (i32, i32) {
    %c0_i32 = arith.constant 0 : i32
    %c0_i32_0 = arith.constant 0 : i32
    %c0_i32_1 = arith.constant 0 : i32
    return %c0_i32, %c0_i32_0 : i32, i32
  }
  func.func @transform_7(%arg0: i32) -> (i32, i32) {
    %c0_i32 = arith.constant 0 : i32
    %c0_i32_0 = arith.constant 0 : i32
    %c0_i32_1 = arith.constant 0 : i32
    return %c0_i32, %c0_i32_0 : i32, i32
  }
  func.func @transform_8(%arg0: i32) -> (i32, i32) {
    %c0_i32 = arith.constant 0 : i32
    %c0_i32_0 = arith.constant 0 : i32
    return %arg0, %c0_i32 : i32, i32
  }
}

</mosaic_0001>

<bundles_post_ra>
// kernel: tpu_custom_call.1
= control target key start
LH: loop header
LB: loop body
LE: loop exit
PB: predicated region body
PF: predicated region fallthrough
CT: control target
= control target key end

     0   :  { %s3008_s27 = smov 0   ;;  %s3010_s28 = smov 0   ;;  %s4035_s0 = inlined_call_operand.vmem [shape: s32[6,256,32], index: 0, kind: input, shape index: {}]   ;;  %s4036_s1 = inlined_call_operand.vmem [shape: f32[256,16], index: 1, kind: input, shape index: {}]   ;;  %s4037_s2 = inlined_call_operand.vmem [shape: bf16[16,32], index: 2, kind: input, shape index: {}]   ;;  %s4038_s3 = inlined_call_operand.vmem [shape: f32[1,32], index: 3, kind: input, shape index: {}]   ;;  %s4039_s4 = inlined_call_operand.vmem [shape: bf16[5,32,32], index: 4, kind: input, shape index: {}]   ;;  %s4040_s5 = inlined_call_operand.vmem [shape: f32[5,1,32], index: 5, kind: input, shape index: {}]   ;;  %s4041_s6 = inlined_call_operand.vmem [shape: bf16[32,8], index: 6, kind: input, shape index: {}]   ;;  %s4042_s7 = inlined_call_operand.vmem [shape: f32[1,8], index: 7, kind: input, shape index: {}]   ;;  %s4043_s8 = inlined_call_operand.vmem [shape: f32[256,8], index: 8, kind: output, shape index: {}]  }
   0x1   :  { %s3012_s29 = smov 0  }
   0x2 LB: > { %s2501_s30 = sadd.s32 4294967295, %s2961_s29   ;;  %s3025_s9 = sadd.s32 1, %s2961_s29   ;;  %s2961_s29 = sphi %s3012_s29, %s4170_s29   ;;  %s2957_s28 = sphi %s3010_s28, %s4169_s28   ;;  %s2953_s27 = sphi %s3008_s27, %s4168_s27  }
   0x3   : > { %s22_s10 = ssub.s32 %s2961_s29, %s3025_s9  ;;  %s25_s11 = sadd.s32 1, %s2957_s28 }
   0x4   : > { %p23_p0 = scmp.eq.s32.totalorder %s22_s10, 0  ;;  %p32_p1 = scmp.ne.s32.totalorder %s2957_s28, %s2953_s27 }
   0x5   : > { %p33_p2 = scmp.eq.s32.totalorder %s2961_s29, 0  ;;  %p2504_p4 = scmp.ge.s32.totalorder %s2961_s29, 2 }
   0x6   : > { %s3034_s12 = scalar_select %p23_p0, %s2957_s28, %s25_s11  }
   0x7   : > { %p34_p3 = por %p33_p2, %p32_p1  ;;  %254 = sbr.rel (%p2504_p4) target bundleno = 65 (0x41), region = 40 }
   0xc   : > { %257 = sbr.rel (!%p34_p3) target bundleno = 65 (0x41), region = 44  ;;  %s259_s13 = sand.u32 (%p34_p3), 1, %s2957_s28  }
   0xd   : > { %s2690_s14 = sshll.u32 (%p34_p3), %s2961_s29, 7  ;;  %s2900_s15 = smul.u32 (%p34_p3), 768, %s259_s13 }
   0xe   : > { %s3042_s18 = scalar_lea.vmem (%p34_p3), %s4035_s0, %s2690_s14 }
   0xf   : > { %v483_v0 = vld [vmem:[%s3042_s18] sm:$0xff] (%p34_p3)  ;;  %v485_v1 = vld [vmem:[%s3042_s18 + $0x8] sm:$0xff] (%p34_p3)  ;;  %v487_v2 = vld [vmem:[%s3042_s18 + $0x10] sm:$0xff] (%p34_p3)  ;;  %s3050_s19 = scalar_lea.vmem (%p34_p3), [#allocation2], %s2900_s15 }
  0x10   : > { %v489_v3 = vld [vmem:[%s3042_s18 + $0x18] sm:$0xff] (%p34_p3)  ;;  %v491_v4 = vld [vmem:[%s3042_s18 + $0x20] sm:$0xff] (%p34_p3)  ;;  %v493_v5 = vld [vmem:[%s3042_s18 + $0x28] sm:$0xff] (%p34_p3)  ;;  %484 = vst [vmem:[%s3050_s19] sm:$0xff] (%p34_p3), %v483_v0 }
  0x11   : > { %486 = vst [vmem:[%s3050_s19 + $0x8] sm:$0xff] %v485_v1  ;;  %488 = vst [vmem:[%s3050_s19 + $0x10] sm:$0xff] %v487_v2  ;;  %v495_v6 = vld [vmem:[%s3042_s18 + $0x30] sm:$0xff]  ;;  %v497_v7 = vld [vmem:[%s3042_s18 + $0x38] sm:$0xff] }
  0x12   : > { %490 = vst [vmem:[%s3050_s19 + $0x18] sm:$0xff] %v489_v3  ;;  %492 = vst [vmem:[%s3050_s19 + $0x20] sm:$0xff] %v491_v4  ;;  %v499_v8 = vld [vmem:[%s3042_s18 + $0x40] sm:$0xff]  ;;  %v501_v9 = vld [vmem:[%s3042_s18 + $0x48] sm:$0xff] }
  0x13   : > { %494 = vst [vmem:[%s3050_s19 + $0x28] sm:$0xff] %v493_v5  ;;  %496 = vst [vmem:[%s3050_s19 + $0x30] sm:$0xff] %v495_v6  ;;  %v503_v10 = vld [vmem:[%s3042_s18 + $0x50] sm:$0xff]  ;;  %v505_v11 = vld [vmem:[%s3042_s18 + $0x58] sm:$0xff] }
  0x14   : > { %498 = vst [vmem:[%s3050_s19 + $0x38] sm:$0xff] %v497_v7  ;;  %500 = vst [vmem:[%s3050_s19 + $0x40] sm:$0xff] %v499_v8  ;;  %v507_v12 = vld [vmem:[%s3042_s18 + $0x60] sm:$0xff]  ;;  %v509_v13 = vld [vmem:[%s3042_s18 + $0x68] sm:$0xff] }
  0x15   : > { %502 = vst [vmem:[%s3050_s19 + $0x48] sm:$0xff] %v501_v9  ;;  %504 = vst [vmem:[%s3050_s19 + $0x50] sm:$0xff] %v503_v10  ;;  %v511_v14 = vld [vmem:[%s3042_s18 + $0x70] sm:$0xff]  ;;  %v513_v15 = vld [vmem:[%s3042_s18 + $0x78] sm:$0xff] }
  0x16   : > { %506 = vst [vmem:[%s3050_s19 + $0x58] sm:$0xff] %v505_v11  ;;  %508 = vst [vmem:[%s3050_s19 + $0x60] sm:$0xff] %v507_v12  ;;  %v515_v16 = vld [vmem:[%s3042_s18 + $0x100] sm:$0xff]  ;;  %v517_v17 = vld [vmem:[%s3042_s18 + $0x108] sm:$0xff] }
  0x17   : > { %510 = vst [vmem:[%s3050_s19 + $0x68] sm:$0xff] %v509_v13  ;;  %512 = vst [vmem:[%s3050_s19 + $0x70] sm:$0xff] %v511_v14  ;;  %v519_v18 = vld [vmem:[%s3042_s18 + $0x110] sm:$0xff]  ;;  %v521_v19 = vld [vmem:[%s3042_s18 + $0x118] sm:$0xff] }
  0x18   : > { %514 = vst [vmem:[%s3050_s19 + $0x78] sm:$0xff] %v513_v15  ;;  %516 = vst [vmem:[%s3050_s19 + $0x80] sm:$0xff] %v515_v16  ;;  %v523_v20 = vld [vmem:[%s3042_s18 + $0x120] sm:$0xff]  ;;  %v525_v21 = vld [vmem:[%s3042_s18 + $0x128] sm:$0xff] }
  0x19   : > { %518 = vst [vmem:[%s3050_s19 + $0x88] sm:$0xff] %v517_v17  ;;  %520 = vst [vmem:[%s3050_s19 + $0x90] sm:$0xff] %v519_v18  ;;  %v527_v22 = vld [vmem:[%s3042_s18 + $0x130] sm:$0xff]  ;;  %v529_v23 = vld [vmem:[%s3042_s18 + $0x138] sm:$0xff] }
  0x1a   : > { %522 = vst [vmem:[%s3050_s19 + $0x98] sm:$0xff] %v521_v19  ;;  %524 = vst [vmem:[%s3050_s19 + $0xa0] sm:$0xff] %v523_v20  ;;  %v531_v24 = vld [vmem:[%s3042_s18 + $0x140] sm:$0xff]  ;;  %v533_v25 = vld [vmem:[%s3042_s18 + $0x148] sm:$0xff] }
  0x1b   : > { %526 = vst [vmem:[%s3050_s19 + $0xa8] sm:$0xff] %v525_v21  ;;  %528 = vst [vmem:[%s3050_s19 + $0xb0] sm:$0xff] %v527_v22  ;;  %v535_v26 = vld [vmem:[%s3042_s18 + $0x150] sm:$0xff]  ;;  %v537_v27 = vld [vmem:[%s3042_s18 + $0x158] sm:$0xff] }
  0x1c   : > { %530 = vst [vmem:[%s3050_s19 + $0xb8] sm:$0xff] %v529_v23  ;;  %532 = vst [vmem:[%s3050_s19 + $0xc0] sm:$0xff] %v531_v24  ;;  %v539_v28 = vld [vmem:[%s3042_s18 + $0x160] sm:$0xff]  ;;  %v541_v29 = vld [vmem:[%s3042_s18 + $0x168] sm:$0xff] }
  0x1d   : > { %534 = vst [vmem:[%s3050_s19 + $0xc8] sm:$0xff] %v533_v25  ;;  %536 = vst [vmem:[%s3050_s19 + $0xd0] sm:$0xff] %v535_v26  ;;  %v543_v30 = vld [vmem:[%s3042_s18 + $0x170] sm:$0xff]  ;;  %v545_v31 = vld [vmem:[%s3042_s18 + $0x178] sm:$0xff] }
  0x1e   : > { %538 = vst [vmem:[%s3050_s19 + $0xd8] sm:$0xff] %v537_v27  ;;  %540 = vst [vmem:[%s3050_s19 + $0xe0] sm:$0xff] %v539_v28  ;;  %v547_v32 = vld [vmem:[%s3042_s18 + $0x200] sm:$0xff]  ;;  %v549_v33 = vld [vmem:[%s3042_s18 + $0x208] sm:$0xff] }
  0x1f   : > { %542 = vst [vmem:[%s3050_s19 + $0xe8] sm:$0xff] %v541_v29  ;;  %544 = vst [vmem:[%s3050_s19 + $0xf0] sm:$0xff] %v543_v30  ;;  %v551_v34 = vld [vmem:[%s3042_s18 + $0x210] sm:$0xff]  ;;  %v553_v35 = vld [vmem:[%s3042_s18 + $0x218] sm:$0xff] }
  0x20   : > { %546 = vst [vmem:[%s3050_s19 + $0xf8] sm:$0xff] %v545_v31  ;;  %548 = vst [vmem:[%s3050_s19 + $0x100] sm:$0xff] %v547_v32  ;;  %v555_v36 = vld [vmem:[%s3042_s18 + $0x220] sm:$0xff]  ;;  %v557_v37 = vld [vmem:[%s3042_s18 + $0x228] sm:$0xff] }
  0x21   : > { %550 = vst [vmem:[%s3050_s19 + $0x108] sm:$0xff] %v549_v33  ;;  %552 = vst [vmem:[%s3050_s19 + $0x110] sm:$0xff] %v551_v34  ;;  %v559_v38 = vld [vmem:[%s3042_s18 + $0x230] sm:$0xff]  ;;  %v561_v39 = vld [vmem:[%s3042_s18 + $0x238] sm:$0xff] }
  0x22   : > { %554 = vst [vmem:[%s3050_s19 + $0x118] sm:$0xff] %v553_v35  ;;  %556 = vst [vmem:[%s3050_s19 + $0x120] sm:$0xff] %v555_v36  ;;  %v563_v40 = vld [vmem:[%s3042_s18 + $0x240] sm:$0xff]  ;;  %v565_v41 = vld [vmem:[%s3042_s18 + $0x248] sm:$0xff] }
  0x23   : > { %558 = vst [vmem:[%s3050_s19 + $0x128] sm:$0xff] %v557_v37  ;;  %560 = vst [vmem:[%s3050_s19 + $0x130] sm:$0xff] %v559_v38  ;;  %v567_v42 = vld [vmem:[%s3042_s18 + $0x250] sm:$0xff]  ;;  %v569_v43 = vld [vmem:[%s3042_s18 + $0x258] sm:$0xff] }
  0x24   : > { %562 = vst [vmem:[%s3050_s19 + $0x138] sm:$0xff] %v561_v39  ;;  %564 = vst [vmem:[%s3050_s19 + $0x140] sm:$0xff] %v563_v40  ;;  %v571_v44 = vld [vmem:[%s3042_s18 + $0x260] sm:$0xff]  ;;  %v573_v45 = vld [vmem:[%s3042_s18 + $0x268] sm:$0xff] }
  0x25   : > { %566 = vst [vmem:[%s3050_s19 + $0x148] sm:$0xff] %v565_v41  ;;  %568 = vst [vmem:[%s3050_s19 + $0x150] sm:$0xff] %v567_v42  ;;  %v575_v46 = vld [vmem:[%s3042_s18 + $0x270] sm:$0xff]  ;;  %v577_v47 = vld [vmem:[%s3042_s18 + $0x278] sm:$0xff] }
  0x26   : > { %570 = vst [vmem:[%s3050_s19 + $0x158] sm:$0xff] %v569_v43  ;;  %572 = vst [vmem:[%s3050_s19 + $0x160] sm:$0xff] %v571_v44  ;;  %v579_v48 = vld [vmem:[%s3042_s18 + $0x300] sm:$0xff]  ;;  %v581_v49 = vld [vmem:[%s3042_s18 + $0x308] sm:$0xff] }
  0x27   : > { %574 = vst [vmem:[%s3050_s19 + $0x168] sm:$0xff] %v573_v45  ;;  %576 = vst [vmem:[%s3050_s19 + $0x170] sm:$0xff] %v575_v46  ;;  %v583_v50 = vld [vmem:[%s3042_s18 + $0x310] sm:$0xff]  ;;  %v585_v51 = vld [vmem:[%s3042_s18 + $0x318] sm:$0xff] }
  0x28   : > { %578 = vst [vmem:[%s3050_s19 + $0x178] sm:$0xff] %v577_v47  ;;  %580 = vst [vmem:[%s3050_s19 + $0x180] sm:$0xff] %v579_v48  ;;  %v587_v52 = vld [vmem:[%s3042_s18 + $0x320] sm:$0xff]  ;;  %v589_v53 = vld [vmem:[%s3042_s18 + $0x328] sm:$0xff] }
  0x29   : > { %582 = vst [vmem:[%s3050_s19 + $0x188] sm:$0xff] %v581_v49  ;;  %584 = vst [vmem:[%s3050_s19 + $0x190] sm:$0xff] %v583_v50  ;;  %v591_v54 = vld [vmem:[%s3042_s18 + $0x330] sm:$0xff]  ;;  %v593_v55 = vld [vmem:[%s3042_s18 + $0x338] sm:$0xff] }
  0x2a   : > { %586 = vst [vmem:[%s3050_s19 + $0x198] sm:$0xff] %v585_v51  ;;  %588 = vst [vmem:[%s3050_s19 + $0x1a0] sm:$0xff] %v587_v52  ;;  %v595_v56 = vld [vmem:[%s3042_s18 + $0x340] sm:$0xff]  ;;  %v597_v57 = vld [vmem:[%s3042_s18 + $0x348] sm:$0xff] }
  0x2b   : > { %590 = vst [vmem:[%s3050_s19 + $0x1a8] sm:$0xff] %v589_v53  ;;  %592 = vst [vmem:[%s3050_s19 + $0x1b0] sm:$0xff] %v591_v54  ;;  %v599_v58 = vld [vmem:[%s3042_s18 + $0x350] sm:$0xff]  ;;  %v601_v59 = vld [vmem:[%s3042_s18 + $0x358] sm:$0xff] }
  0x2c   : > { %594 = vst [vmem:[%s3050_s19 + $0x1b8] sm:$0xff] %v593_v55  ;;  %596 = vst [vmem:[%s3050_s19 + $0x1c0] sm:$0xff] %v595_v56  ;;  %v603_v60 = vld [vmem:[%s3042_s18 + $0x360] sm:$0xff]  ;;  %v605_v61 = vld [vmem:[%s3042_s18 + $0x368] sm:$0xff] }
  0x2d   : > { %598 = vst [vmem:[%s3050_s19 + $0x1c8] sm:$0xff] %v597_v57  ;;  %600 = vst [vmem:[%s3050_s19 + $0x1d0] sm:$0xff] %v599_v58  ;;  %v607_v62 = vld [vmem:[%s3042_s18 + $0x370] sm:$0xff]  ;;  %v609_v63 = vld [vmem:[%s3042_s18 + $0x378] sm:$0xff] }
  0x2e   : > { %602 = vst [vmem:[%s3050_s19 + $0x1d8] sm:$0xff] %v601_v59  ;;  %604 = vst [vmem:[%s3050_s19 + $0x1e0] sm:$0xff] %v603_v60  ;;  %v611_v0 = vld [vmem:[%s3042_s18 + $0x400] sm:$0xff]  ;;  %v613_v1 = vld [vmem:[%s3042_s18 + $0x408] sm:$0xff] }
  0x2f   : > { %606 = vst [vmem:[%s3050_s19 + $0x1e8] sm:$0xff] %v605_v61  ;;  %608 = vst [vmem:[%s3050_s19 + $0x1f0] sm:$0xff] %v607_v62  ;;  %v615_v2 = vld [vmem:[%s3042_s18 + $0x410] sm:$0xff]  ;;  %v617_v3 = vld [vmem:[%s3042_s18 + $0x418] sm:$0xff] }
  0x30   : > { %610 = vst [vmem:[%s3050_s19 + $0x1f8] sm:$0xff] %v609_v63  ;;  %612 = vst [vmem:[%s3050_s19 + $0x200] sm:$0xff] %v611_v0  ;;  %v619_v4 = vld [vmem:[%s3042_s18 + $0x420] sm:$0xff]  ;;  %v621_v5 = vld [vmem:[%s3042_s18 + $0x428] sm:$0xff] }
  0x31   : > { %614 = vst [vmem:[%s3050_s19 + $0x208] sm:$0xff] %v613_v1  ;;  %616 = vst [vmem:[%s3050_s19 + $0x210] sm:$0xff] %v615_v2  ;;  %v623_v6 = vld [vmem:[%s3042_s18 + $0x430] sm:$0xff]  ;;  %v625_v7 = vld [vmem:[%s3042_s18 + $0x438] sm:$0xff] }
  0x32   : > { %618 = vst [vmem:[%s3050_s19 + $0x218] sm:$0xff] %v617_v3  ;;  %620 = vst [vmem:[%s3050_s19 + $0x220] sm:$0xff] %v619_v4  ;;  %v627_v8 = vld [vmem:[%s3042_s18 + $0x440] sm:$0xff]  ;;  %v629_v9 = vld [vmem:[%s3042_s18 + $0x448] sm:$0xff] }
  0x33   : > { %622 = vst [vmem:[%s3050_s19 + $0x228] sm:$0xff] %v621_v5  ;;  %624 = vst [vmem:[%s3050_s19 + $0x230] sm:$0xff] %v623_v6  ;;  %v631_v10 = vld [vmem:[%s3042_s18 + $0x450] sm:$0xff]  ;;  %v633_v11 = vld [vmem:[%s3042_s18 + $0x458] sm:$0xff] }
  0x34   : > { %626 = vst [vmem:[%s3050_s19 + $0x238] sm:$0xff] %v625_v7  ;;  %628 = vst [vmem:[%s3050_s19 + $0x240] sm:$0xff] %v627_v8  ;;  %v635_v12 = vld [vmem:[%s3042_s18 + $0x460] sm:$0xff]  ;;  %v637_v13 = vld [vmem:[%s3042_s18 + $0x468] sm:$0xff] }
  0x35   : > { %630 = vst [vmem:[%s3050_s19 + $0x248] sm:$0xff] %v629_v9  ;;  %632 = vst [vmem:[%s3050_s19 + $0x250] sm:$0xff] %v631_v10  ;;  %v639_v14 = vld [vmem:[%s3042_s18 + $0x470] sm:$0xff]  ;;  %v641_v15 = vld [vmem:[%s3042_s18 + $0x478] sm:$0xff] }
  0x36   : > { %634 = vst [vmem:[%s3050_s19 + $0x258] sm:$0xff] %v633_v11  ;;  %636 = vst [vmem:[%s3050_s19 + $0x260] sm:$0xff] %v635_v12  ;;  %v643_v16 = vld [vmem:[%s3042_s18 + $0x500] sm:$0xff]  ;;  %v645_v17 = vld [vmem:[%s3042_s18 + $0x508] sm:$0xff] }
  0x37   : > { %638 = vst [vmem:[%s3050_s19 + $0x268] sm:$0xff] %v637_v13  ;;  %640 = vst [vmem:[%s3050_s19 + $0x270] sm:$0xff] %v639_v14  ;;  %v647_v18 = vld [vmem:[%s3042_s18 + $0x510] sm:$0xff]  ;;  %v649_v19 = vld [vmem:[%s3042_s18 + $0x518] sm:$0xff] }
  0x38   : > { %642 = vst [vmem:[%s3050_s19 + $0x278] sm:$0xff] %v641_v15  ;;  %644 = vst [vmem:[%s3050_s19 + $0x280] sm:$0xff] %v643_v16  ;;  %v651_v20 = vld [vmem:[%s3042_s18 + $0x520] sm:$0xff]  ;;  %v653_v21 = vld [vmem:[%s3042_s18 + $0x528] sm:$0xff] }
  0x39   : > { %646 = vst [vmem:[%s3050_s19 + $0x288] sm:$0xff] %v645_v17  ;;  %648 = vst [vmem:[%s3050_s19 + $0x290] sm:$0xff] %v647_v18  ;;  %v655_v22 = vld [vmem:[%s3042_s18 + $0x530] sm:$0xff]  ;;  %v657_v23 = vld [vmem:[%s3042_s18 + $0x538] sm:$0xff] }
  0x3a   : > { %650 = vst [vmem:[%s3050_s19 + $0x298] sm:$0xff] %v649_v19  ;;  %652 = vst [vmem:[%s3050_s19 + $0x2a0] sm:$0xff] %v651_v20  ;;  %v659_v24 = vld [vmem:[%s3042_s18 + $0x540] sm:$0xff]  ;;  %v661_v25 = vld [vmem:[%s3042_s18 + $0x548] sm:$0xff] }
  0x3b   : > { %654 = vst [vmem:[%s3050_s19 + $0x2a8] sm:$0xff] %v653_v21  ;;  %656 = vst [vmem:[%s3050_s19 + $0x2b0] sm:$0xff] %v655_v22  ;;  %v663_v26 = vld [vmem:[%s3042_s18 + $0x550] sm:$0xff]  ;;  %v665_v27 = vld [vmem:[%s3042_s18 + $0x558] sm:$0xff] }
  0x3c   : > { %658 = vst [vmem:[%s3050_s19 + $0x2b8] sm:$0xff] %v657_v23  ;;  %660 = vst [vmem:[%s3050_s19 + $0x2c0] sm:$0xff] %v659_v24  ;;  %v667_v28 = vld [vmem:[%s3042_s18 + $0x560] sm:$0xff]  ;;  %v669_v29 = vld [vmem:[%s3042_s18 + $0x568] sm:$0xff] }
  0x3d   : > { %662 = vst [vmem:[%s3050_s19 + $0x2c8] sm:$0xff] %v661_v25  ;;  %664 = vst [vmem:[%s3050_s19 + $0x2d0] sm:$0xff] %v663_v26  ;;  %v671_v30 = vld [vmem:[%s3042_s18 + $0x570] sm:$0xff]  ;;  %v673_v31 = vld [vmem:[%s3042_s18 + $0x578] sm:$0xff] }
  0x3e   : > { %666 = vst [vmem:[%s3050_s19 + $0x2d8] sm:$0xff] %v665_v27  ;;  %668 = vst [vmem:[%s3050_s19 + $0x2e0] sm:$0xff] %v667_v28 }
  0x3f   : > { %670 = vst [vmem:[%s3050_s19 + $0x2e8] sm:$0xff] %v669_v29  ;;  %672 = vst [vmem:[%s3050_s19 + $0x2f0] sm:$0xff] %v671_v30 }
  0x40   : > { %674 = vst [vmem:[%s3050_s19 + $0x2f8] sm:$0xff] %v673_v31 }
  0x41 PF: > { %p2507_p5 = scmp.ge.s32.totalorder %s2961_s29, 1  ;;  %p688_p6 = scmp.lt.s32.totalorder %s2961_s29, 3 }
  0x43   : > { %p689_p7 = pnand %p2507_p5, %p688_p6 }
  0x44   : > { %s2508_s22 = sshll.u32 (!%p689_p7), %s2501_s30, 4  ;;  %s695_s15 = sand.u32 (!%p689_p7), 1, %s2953_s27  }
  0x45   : > { %692 = sbr.rel (%p689_p7) target bundleno = 1549 (0x60d), region = 86  ;;  %p735_p8 = scmp.lt.s32.totalorder (!%p689_p7), %s2508_s22, 31 }
  0x46   : > { %s2901_s16 = smul.u32 (!%p689_p7), 768, %s695_s15 }
  0x48   : > { %s3276_s19 = scalar_lea.vmem (!%p689_p7), [#allocation2], %s2901_s16 }
  0x4a   : > { %v2926_v32 = vld [vmem:[%s4037_s2] sm:$0xff]   ;;  %v2927_v33 = vld [vmem:[%s4039_s4 + $0x8] sm:$0xff]   ;;  %s4172_s22 = smov (!%p735_p8, %s2508_s22), 31  ;;  %vm786_vm0 = vcmask 130048   ;;  %v2929_v59 = vld [vmem:[%s4039_s4 + $0x18] sm:$0xff]   ;;  %vm1035_vm12 = vcmask 261120  }
  0x4b   : > { %2760 = vmatprep.subr.bf16.mxu0 %v2926_v32  ;;  %2898 = vmatprep.subr.bf16.mxu1 %v2926_v32  ;;  %s2509_s25 = sshll.u32 %s4172_s22, 3  ;;  %v2928_v58 = vld [vmem:[%s4039_s4] sm:$0xff]   ;;  %v911_v1 = vld [vmem:[%s3276_s19 + $0x18] sm:$0xff]  ;;  %v910_v2 = vld [vmem:[%s3276_s19 + $0x10] sm:$0xff] }
  0x4c   : > { %2761 = vmatpush3.bf16.msra.mxu0 %v2926_v32  ;;  %2899 = vmatpush3.bf16.msra.mxu1 %v2926_v32  ;;  %s738_s29 = scalar_lea.vmem %s4036_s1, %s2509_s25  ;;  %v3274_v60 = vld [vmem:[%s4038_s3] ss:$0 sm:$0xff]  ;;  %v909_v4 = vld [vmem:[%s3276_s19 + $0x8] sm:$0xff]  ;;  %vm927_vm3 = vcmp.ge.s32.totalorder %v911_v1, 0  ;;  %v3286_v8 = vld [vmem:[%s3276_s19 + $0x30] sm:$0xff]  ;;  %vm926_vm4 = vcmp.ge.s32.totalorder %v910_v2, 0  ;;  %s3991_s18 = scalar_lea.vmem %s4043_s8, %s2509_s25 }
  0x4d   : > { %2778 = vmatprep.subr.bf16.mxu1 %v2927_v33  ;;  %v747_v34 = vld [vmem:[%s738_s29] sm:$0xff]  ;;  %v748_v35 = vld [vmem:[%s738_s29 + $0x8] sm:$0xff]  ;;  %v749_v36 = vld [vmem:[%s738_s29 + $0x10] sm:$0xff]  ;;  %2798 = vmatprep.subr.bf16.mxu0 %v2929_v59  ;;  %vm925_vm6 = vcmp.ge.s32.totalorder %v909_v4, 0  ;;  %vm930_vm10 = vcmp.ge.s32.totalorder %v3286_v8, 0 }
  0x4e   : > { %v766_v37 = vpack.c.bf16 %v748_v35, %v747_v34  ;;  %v750_v38 = vld [vmem:[%s738_s29 + $0x18] sm:$0xff]  ;;  %v751_v39 = vld [vmem:[%s738_s29 + $0x20] sm:$0xff]  ;;  %v752_v40 = vld [vmem:[%s738_s29 + $0x28] sm:$0xff] }
  0x4f   : > { %v767_v41 = vpack.c.bf16 %v750_v38, %v749_v36  ;;  %v768_v42 = vpack.c.bf16 %v752_v40, %v751_v39  ;;  %v755_v43 = vld [vmem:[%s738_s29 + $0x40] sm:$0xff]  ;;  %v756_v44 = vld [vmem:[%s738_s29 + $0x48] sm:$0xff]  ;;  %v757_v45 = vld [vmem:[%s738_s29 + $0x50] sm:$0xff] }
  0x50   : > { %2762 = vmatprep.mubr.msk.bf16.mxu0 %vm786_vm0, %v766_v37  ;;  %v758_v46 = vld [vmem:[%s738_s29 + $0x58] sm:$0xff]  ;;  %v753_v47 = vld [vmem:[%s738_s29 + $0x30] sm:$0xff]  ;;  %v770_v48 = vpack.c.bf16 %v756_v44, %v755_v43  ;;  %v759_v50 = vld [vmem:[%s738_s29 + $0x60] sm:$0xff] }
  0x51   : > { %2763 = vmatmul.mubr.msk.bf16.vlgmr.msra.gmra.mxu0 %vm786_vm0, %v767_v41  ;;  %v771_v49 = vpack.c.bf16 %v758_v46, %v757_v45  ;;  %v760_v51 = vld [vmem:[%s738_s29 + $0x68] sm:$0xff]  ;;  %v754_v52 = vld [vmem:[%s738_s29 + $0x38] sm:$0xff]  ;;  %v761_v54 = vld [vmem:[%s738_s29 + $0x70] sm:$0xff] }
  0x52   : > { %2766 = vmatprep.mubr.msk.bf16.mxu0 %vm786_vm0, %v768_v42  ;;  %v772_v53 = vpack.c.bf16 %v760_v51, %v759_v50  ;;  %2770 = vmatprep.mubr.msk.bf16.mxu1 %vm786_vm0, %v770_v48  ;;  %v762_v55 = vld [vmem:[%s738_s29 + $0x78] sm:$0xff]  ;;  %v769_v56 = vpack.c.bf16 %v754_v52, %v753_v47  ;;  %v908_v62 = vld [vmem:[%s3276_s19] sm:$0xff]  ;;  %v3290_v12 = vld [vmem:[%s3276_s19 + $0x50] sm:$0xff] }
  0x53   : > { %2771 = vmatmul.mubr.msk.bf16.vlgmr.msra.gmra.mxu1 %vm786_vm0, %v771_v49  ;;  %v773_v57 = vpack.c.bf16 %v762_v55, %v761_v54  ;;  %2799 = vmatpush3.bf16.msra.mxu0 %v2929_v59  ;;  %vm924_vm1 = vcmp.ge.s32.totalorder %v908_v62, 0  ;;  %v912_v9 = vld [vmem:[%s3276_s19 + $0x20] sm:$0xff]  ;;  %v3293_v13 = vld [vmem:[%s3276_s19 + $0x38] sm:$0xff]  ;;  %v917_v24 = vld [vmem:[%s3276_s19 + $0x48] sm:$0xff]  ;;  %vm934_vm15 = vcmp.ge.s32.totalorder %v3290_v12, 0 }
  0x54   : > { %2774 = vmatprep.mubr.msk.bf16.mxu1 %vm786_vm0, %v772_v53  ;;  %2779 = vmatpush3.bf16.msra.mxu1 %v2927_v33  ;;  %v916_v19 = vld [vmem:[%s3276_s19 + $0x40] sm:$0xff]  ;;  %vm928_vm11 = vcmp.ge.s32.totalorder %v912_v9, 0  ;;  %v913_v34 = vld [vmem:[%s3276_s19 + $0x28] sm:$0xff]  ;;  %v919_v52 = vld [vmem:[%s3276_s19 + $0x58] sm:$0xff] }
  0x55   : > { %2780 = vmatprep.subr.bf16.mxu1 %v2928_v58  ;;  %v920_v54 = vld [vmem:[%s3276_s19 + $0x60] sm:$0xff]  ;;  %v2540_v62 = vld [vmem:[%s3276_s19 + $0xb8] sm:$0xff]  ;;  %v2546_v53 = vld [vmem:[%s3276_s19 + $0xe8] sm:$0xff] }
  0x58   : > { %2781 = vmatpush3.bf16.msra.mxu1 %v2928_v58 }
  0x59   : > { %2767 = vmatmul.mubr.msk.bf16.gmra.mxu0 %vm786_vm0, %v769_v56 }
  0x5b   : > { %2775 = vmatmul.mubr.msk.bf16.gmra.mxu1 %vm786_vm0, %v773_v57  ;;  %vm931_vm0 = vcmp.ge.s32.totalorder %v3293_v13, 0  ;;  %v2537_v57 = vld [vmem:[%s3276_s19 + $0xa0] sm:$0xff] }
 0x111   : > { %v2764_v61 = vpop.f32.mrf.mxu0 }
 0x112   : > { %v854_v63 = vadd.f32 %v2764_v61, %v3274_v60  ;;  %v921_v61 = vld [vmem:[%s3276_s19 + $0x68] sm:$0xff] }
 0x113   : > { %v845_v0 = vpop.f32.mrf.mxu0  ;;  %v2772_v5 = vpop.f32.mrf.mxu1 }
 0x114   : > { %v846_v3 = vadd.f32 %v3274_v60, %v845_v0  ;;  %vm942_vm5 = vcmp.gt.f32.partialorder %v854_v63, 0.0  ;;  %v974_v21 = vmul.f32 2.0, %v854_v63  ;;  %v886_v38 = vadd.f32 %v2772_v5, %v3274_v60 }
 0x115   : > { %v2765_v6 = vpop.f32.mrf.mxu0  ;;  %v877_v10 = vpop.f32.mrf.mxu1  ;;  %vm3312_vm13 = vmand %vm926_vm4, %vm942_vm5  ;;  %vm933_vm4 = vcmp.ge.s32.totalorder %v917_v24, 0 }
 0x116   : > { %vm940_vm2 = vcmp.gt.f32.partialorder %v846_v3, 0.0  ;;  %v857_v7 = vadd.f32 %v2765_v6, %v3274_v60  ;;  %v878_v14 = vadd.f32 %v3274_v60, %v877_v10  ;;  %v972_v16 = vmul.f32 2.0, %v846_v3 }
 0x117   : > { %v848_v11 = vpop.f32.mrf.mxu0  ;;  %vm3297_vm7 = vmand %vm924_vm1, %vm940_vm2  ;;  %v2773_v20 = vpop.f32.mrf.mxu1  ;;  %vm932_vm2 = vcmp.ge.s32.totalorder %v916_v19, 0  ;;  %v990_v36 = vsel %vm3312_vm13, %v974_v21, 0.0 }
 0x118   : > { %vm943_vm8 = vcmp.gt.f32.partialorder %v857_v7, 0.0  ;;  %v975_v17 = vmul.f32 2.0, %v857_v7  ;;  %v849_v18 = vadd.f32 %v3274_v60, %v848_v11  ;;  %v988_v31 = vsel %vm3297_vm7, %v972_v16, 0.0 }
 0x119   : > { %vm3304_vm9 = vmand %vm927_vm3, %vm943_vm8  ;;  %v2768_v23 = vpop.f32.mrf.mxu0  ;;  %v880_v27 = vpop.f32.mrf.mxu1  ;;  %vm948_vm3 = vcmp.gt.f32.partialorder %v878_v14, 0.0  ;;  %v980_v44 = vmul.f32 2.0, %v878_v14  ;;  %v889_v58 = vadd.f32 %v2773_v20, %v3274_v60  ;;  %v982_v16 = vmul.f32 2.0, %v886_v38  ;;  %v922_v20 = vld [vmem:[%s3276_s19 + $0x70] sm:$0xff] }
 0x11a   : > { %vm941_vm14 = vcmp.gt.f32.partialorder %v849_v18, 0.0  ;;  %v973_v26 = vmul.f32 2.0, %v849_v18  ;;  %v991_v28 = vsel %vm3304_vm9, %v975_v17, 0.0  ;;  %v870_v29 = vadd.f32 %v2768_v23, %v3274_v60  ;;  %v923_v23 = vld [vmem:[%s3276_s19 + $0x78] sm:$0xff] }
 0x11b   : > { %vm957_vm1 = vmand %vm925_vm6, %vm941_vm14  ;;  %v861_v30 = vpop.f32.mrf.mxu0  ;;  %v3326_v35 = vpop.f32.mrf.mxu1  ;;  %v881_v40 = vadd.f32 %v3274_v60, %v880_v27  ;;  %v1010_v41 = vpack.c.bf16 %v991_v28, %v990_v36  ;;  %vm929_vm9 = vcmp.ge.s32.totalorder %v913_v34, 0  ;;  %v983_v17 = vmul.f32 2.0, %v889_v58  ;;  %v2931_v34 = vld [vmem:[%s4039_s4 + $0x28] sm:$0xff]   ;;  %v3433_v36 = vld [vmem:[%s4040_s5] ss:$0 sm:$0xff] }
 0x11c   : > { %v989_v32 = vsel %vm957_vm1, %v973_v26, 0.0  ;;  %v862_v33 = vadd.f32 %v3274_v60, %v861_v30  ;;  %vm3335_vm6 = vmand %vm932_vm2, %vm948_vm3  ;;  %vm946_vm7 = vcmp.gt.f32.partialorder %v870_v29, 0.0  ;;  %v978_v56 = vmul.f32 2.0, %v870_v29  ;;  %2818 = vmatprep.subr.bf16.mxu1 %v2931_v34 }
 0x11d   : > { %v1009_v37 = vpack.c.bf16 %v989_v32, %v988_v31  ;;  %v2769_v39 = vpop.f32.mrf.mxu0  ;;  %v893_v45 = vpop.f32.mrf.mxu1  ;;  %vm949_vm13 = vcmp.gt.f32.partialorder %v881_v40, 0.0  ;;  %v981_v48 = vmul.f32 2.0, %v881_v40  ;;  %vm950_vm1 = vcmp.gt.f32.partialorder %v886_v38, 0.0  ;;  %vm3366_vm3 = vmand %vm930_vm10, %vm946_vm7  ;;  %v2533_v38 = vld [vmem:[%s3276_s19 + $0x80] sm:$0xff] }
 0x11e   : > { %vm944_vm5 = vcmp.gt.f32.partialorder %v862_v33, 0.0  ;;  %v873_v42 = vadd.f32 %v2769_v39, %v3274_v60  ;;  %v976_v49 = vmul.f32 2.0, %v862_v33  ;;  %v894_v59 = vadd.f32 %v3274_v60, %v893_v45  ;;  %vm3385_vm7 = vmand %vm934_vm15, %vm950_vm1  ;;  %v2930_v33 = vld [vmem:[%s4039_s4 + $0x10] sm:$0xff]  }
 0x11f   : > { %vm3340_vm8 = vmand %vm928_vm11, %vm944_vm5  ;;  %v864_v47 = vpop.f32.mrf.mxu0  ;;  %2782 = vmatprep.mubr.msk.bf16.mxu1 %vm1035_vm12, %v1009_v37  ;;  %v2777_v55 = vpop.f32.mrf.mxu1  ;;  %v996_v63 = vsel %vm3335_vm6, %v980_v44, 0.0  ;;  %vm935_vm5 = vcmp.ge.s32.totalorder %v919_v52, 0  ;;  %vm937_vm6 = vcmp.ge.s32.totalorder %v921_v61, 0  ;;  %v994_v7 = vsel %vm3366_vm3, %v978_v56, 0.0  ;;  %2800 = vmatprep.subr.bf16.mxu0 %v2930_v33  ;;  %v2534_v44 = vld [vmem:[%s3276_s19 + $0x88] sm:$0xff] }
 0x120   : > { %vm947_vm14 = vcmp.gt.f32.partialorder %v873_v42, 0.0  ;;  %v979_v50 = vmul.f32 2.0, %v873_v42  ;;  %v865_v51 = vadd.f32 %v3274_v60, %v864_v47  ;;  %2783 = vmatmul.mubr.msk.bf16.vlgmr.msra.gmra.mxu1 %vm1035_vm12, %v1010_v41  ;;  %vm3349_vm11 = vmand %vm933_vm4, %vm949_vm13  ;;  %vm936_vm13 = vcmp.ge.s32.totalorder %v920_v54, 0  ;;  %2801 = vmatpush3.bf16.msra.mxu0 %v2930_v33  ;;  %v2536_v41 = vld [vmem:[%s3276_s19 + $0x98] sm:$0xff]  ;;  %v2535_v42 = vld [vmem:[%s3276_s19 + $0x90] sm:$0xff] }
 0x121   : > { %vm3356_vm2 = vmand %vm931_vm0, %vm947_vm14  ;;  %v997_v1 = vsel %vm3349_vm11, %v981_v48, 0.0  ;;  %v896_v2 = vpop.f32.mrf.mxu1  ;;  %vm952_vm10 = vcmp.gt.f32.partialorder %v894_v59, 0.0  ;;  %v992_v4 = vsel %vm3340_vm8, %v976_v49, 0.0  ;;  %v984_v14 = vmul.f32 2.0, %v894_v59  ;;  %2819 = vmatpush3.bf16.msra.mxu1 %v2931_v34  ;;  %v2548_v48 = vld [vmem:[%s3276_s19 + $0xf8] sm:$0xff] }
 0x122   : > { %vm945_vm4 = vcmp.gt.f32.partialorder %v865_v51, 0.0  ;;  %v977_v0 = vmul.f32 2.0, %v865_v51  ;;  %v995_v3 = vsel %vm3356_vm2, %v979_v50, 0.0  ;;  %v897_v6 = vadd.f32 %v3274_v60, %v896_v2  ;;  %vm3389_vm8 = vmand %vm936_vm13, %vm952_vm10  ;;  %v2572_v34 = vld [vmem:[%s3276_s19 + $0x138] sm:$0xff] }
 0x123   : > { %vm961_vm0 = vmand %vm929_vm9, %vm945_vm4  ;;  %vm951_vm9 = vcmp.gt.f32.partialorder %v889_v58, 0.0  ;;  %v1013_v10 = vpack.c.bf16 %v997_v1, %v996_v63  ;;  %v1012_v11 = vpack.c.bf16 %v995_v3, %v994_v7  ;;  %v902_v19 = vadd.f32 %v3326_v35, %v3274_v60  ;;  %v2932_v35 = vld [vmem:[%s4039_s4 + $0x20] sm:$0xff]   ;;  %v2539_v1 = vld [vmem:[%s3276_s19 + $0xb0] sm:$0xff] }
 0x124   : > { %v993_v5 = vsel %vm961_vm0, %v977_v0, 0.0  ;;  %vm953_vm14 = vcmp.gt.f32.partialorder %v897_v6, 0.0  ;;  %v985_v15 = vmul.f32 2.0, %v897_v6  ;;  %vm3399_vm11 = vmand %vm935_vm5, %vm951_vm9  ;;  %v905_v21 = vadd.f32 %v2777_v55, %v3274_v60  ;;  %2820 = vmatprep.subr.bf16.mxu1 %v2932_v35  ;;  %v2538_v3 = vld [vmem:[%s3276_s19 + $0xa8] sm:$0xff] }
 0x125   : > { %v1011_v9 = vpack.c.bf16 %v993_v5, %v992_v4  ;;  %vm3394_vm15 = vmand %vm937_vm6, %vm953_vm14  ;;  %v1000_v22 = vsel %vm3389_vm8, %v984_v14, 0.0  ;;  %v998_v25 = vsel %vm3385_vm7, %v982_v16, 0.0  ;;  %v999_v26 = vsel %vm3399_vm11, %v983_v17, 0.0  ;;  %2821 = vmatpush3.bf16.msra.mxu1 %v2932_v35  ;;  %v2568_v16 = vld [vmem:[%s3276_s19 + $0x118] sm:$0xff] }
 0x126   : > { %v1001_v24 = vsel %vm3394_vm15, %v985_v15, 0.0  ;;  %vm938_vm1 = vcmp.ge.s32.totalorder %v922_v20, 0  ;;  %vm954_vm2 = vcmp.gt.f32.partialorder %v902_v19, 0.0  ;;  %vm939_vm3 = vcmp.ge.s32.totalorder %v923_v23, 0  ;;  %v2544_v23 = vld [vmem:[%s3276_s19 + $0xd8] sm:$0xff] }
 0x127   : > { %2786 = vmatprep.mubr.msk.bf16.mxu1 %vm1035_vm12, %v1011_v9  ;;  %vm955_vm4 = vcmp.gt.f32.partialorder %v905_v21, 0.0  ;;  %v1015_v60 = vpack.c.bf16 %v1001_v24, %v1000_v22  ;;  %v1014_v27 = vpack.c.bf16 %v999_v26, %v998_v25  ;;  %vm970_vm0 = vmand %vm938_vm1, %vm954_vm2  ;;  %v986_v28 = vmul.f32 2.0, %v902_v19  ;;  %v2541_v19 = vld [vmem:[%s3276_s19 + $0xc0] sm:$0xff]  ;;  %v2543_v26 = vld [vmem:[%s3276_s19 + $0xd0] sm:$0xff] }
 0x128   : > { %2787 = vmatmul.mubr.msk.bf16.gmra.mxu1 %vm1035_vm12, %v1012_v11  ;;  %v987_v29 = vmul.f32 2.0, %v905_v21  ;;  %vm971_vm5 = vmand %vm939_vm3, %vm955_vm4  ;;  %vm1174_vm13 = vcmp.ge.s32.totalorder %v2533_v38, 0  ;;  %vm1177_vm6 = vcmp.ge.s32.totalorder %v2536_v41, 0  ;;  %vm1176_vm7 = vcmp.ge.s32.totalorder %v2535_v42, 0 }
 0x129   : > { %2790 = vmatprep.mubr.msk.bf16.mxu1 %vm1035_vm12, %v1013_v10  ;;  %v1002_v30 = vsel %vm970_vm0, %v986_v28, 0.0  ;;  %vm1175_vm8 = vcmp.ge.s32.totalorder %v2534_v44, 0  ;;  %vm1178_vm4 = vcmp.ge.s32.totalorder %v2537_v57, 0  ;;  %v2545_v44 = vld [vmem:[%s3276_s19 + $0xe0] sm:$0xff] }
 0x12a   : > { %v1003_v31 = vsel %vm971_vm5, %v987_v29, 0.0  ;;  %vm1181_vm5 = vcmp.ge.s32.totalorder %v2540_v62, 0  ;;  %v3546_v10 = vld [vmem:[%s4040_s5 + $0x1] ss:$0 sm:$0xff] }
 0x12b   : > { %v1016_v32 = vpack.c.bf16 %v1003_v31, %v1002_v30 }
 0x130   : > { %2791 = vmatmul.mubr.msk.bf16.gmra.mxu1 %vm1035_vm12, %v1014_v27  ;;  %v2542_v27 = vld [vmem:[%s3276_s19 + $0xc8] sm:$0xff] }
 0x131   : > { %2794 = vmatprep.mubr.msk.bf16.mxu1 %vm1035_vm12, %v1015_v60 }
 0x138   : > { %2795 = vmatmul.mubr.msk.bf16.gmra.mxu1 %vm1035_vm12, %v1016_v32 }
 0x1e0   : > { %v2784_v37 = vpop.f32.mrf.mxu1 }
 0x1e1   : > { %v1103_v39 = vadd.f32 %v2784_v37, %v3433_v36 }
 0x1e2   : > { %v1094_v40 = vpop.f32.mrf.mxu1 }
 0x1e3   : > { %v1095_v43 = vadd.f32 %v3433_v36, %v1094_v40  ;;  %vm1192_vm9 = vcmp.gt.f32.partialorder %v1103_v39, 0.0  ;;  %v1224_v52 = vmul.f32 2.0, %v1103_v39  ;;  %v2570_v40 = vld [vmem:[%s3276_s19 + $0x128] sm:$0xff] }
 0x1e4   : > { %v2785_v45 = vpop.f32.mrf.mxu1  ;;  %vm3451_vm1 = vmand %vm1176_vm7, %vm1192_vm9 }
 0x1e5   : > { %vm1190_vm10 = vcmp.gt.f32.partialorder %v1095_v43, 0.0  ;;  %v1106_v46 = vadd.f32 %v2785_v45, %v3433_v36  ;;  %v1222_v49 = vmul.f32 2.0, %v1095_v43  ;;  %v1240_v4 = vsel %vm3451_vm1, %v1224_v52, 0.0 }
 0x1e6   : > { %v1097_v47 = vpop.f32.mrf.mxu1  ;;  %vm3442_vm14 = vmand %vm1174_vm13, %vm1190_vm10  ;;  %vm1180_vm13 = vcmp.ge.s32.totalorder %v2539_v1, 0  ;;  %vm1182_vm1 = vcmp.ge.s32.totalorder %v2541_v19, 0 }
 0x1e7   : > { %vm1193_vm15 = vcmp.gt.f32.partialorder %v1106_v46, 0.0  ;;  %v1225_v50 = vmul.f32 2.0, %v1106_v46  ;;  %v1098_v51 = vadd.f32 %v3433_v36, %v1097_v47  ;;  %v1238_v63 = vsel %vm3442_vm14, %v1222_v49, 0.0 }
 0x1e8   : > { %vm3447_vm11 = vmand %vm1177_vm6, %vm1193_vm15  ;;  %v2788_v54 = vpop.f32.mrf.mxu1  ;;  %vm1179_vm6 = vcmp.ge.s32.totalorder %v2538_v3, 0 }
 0x1e9   : > { %vm1191_vm2 = vcmp.gt.f32.partialorder %v1098_v51, 0.0  ;;  %v1223_v56 = vmul.f32 2.0, %v1098_v51  ;;  %v1241_v58 = vsel %vm3447_vm11, %v1225_v50, 0.0  ;;  %v1119_v59 = vadd.f32 %v2788_v54, %v3433_v36  ;;  %v2547_v51 = vld [vmem:[%s3276_s19 + $0xf0] sm:$0xff] }
 0x1ea   : > { %vm1207_vm3 = vmand %vm1175_vm8, %vm1191_vm2  ;;  %v1110_v61 = vpop.f32.mrf.mxu1  ;;  %v1262_v7 = vpack.c.bf16 %v1241_v58, %v1240_v4 }
 0x1eb   : > { %v1239_v0 = vsel %vm1207_vm3, %v1223_v56, 0.0  ;;  %v1111_v2 = vadd.f32 %v3433_v36, %v1110_v61  ;;  %vm1196_vm10 = vcmp.gt.f32.partialorder %v1119_v59, 0.0  ;;  %v1228_v15 = vmul.f32 2.0, %v1119_v59  ;;  %v2576_v61 = vld [vmem:[%s3276_s19 + $0x158] sm:$0xff] }
 0x1ec   : > { %v1261_v5 = vpack.c.bf16 %v1239_v0, %v1238_v63  ;;  %v2789_v6 = vpop.f32.mrf.mxu1  ;;  %vm3479_vm14 = vmand %vm1180_vm13, %vm1196_vm10  ;;  %vm1185_vm3 = vcmp.ge.s32.totalorder %v2544_v23, 0 }
 0x1ed   : > { %vm1194_vm0 = vcmp.gt.f32.partialorder %v1111_v2, 0.0  ;;  %v1122_v8 = vadd.f32 %v2789_v6, %v3433_v36  ;;  %v1226_v11 = vmul.f32 2.0, %v1111_v2  ;;  %v1244_v28 = vsel %vm3479_vm14, %v1228_v15, 0.0 }
 0x1ee   : > { %v1113_v9 = vpop.f32.mrf.mxu1  ;;  %2802 = vmatprep.mubr.msk.bf16.mxu0 %vm1035_vm12, %v1261_v5  ;;  %vm3469_vm7 = vmand %vm1178_vm4, %vm1194_vm0  ;;  %vm1184_vm4 = vcmp.ge.s32.totalorder %v2543_v26, 0  ;;  %vm1186_vm14 = vcmp.ge.s32.totalorder %v2545_v44, 0 }
 0x1ef   : > { %vm1197_vm9 = vcmp.gt.f32.partialorder %v1122_v8, 0.0  ;;  %v1229_v13 = vmul.f32 2.0, %v1122_v8  ;;  %v1114_v14 = vadd.f32 %v3433_v36, %v1113_v9  ;;  %2803 = vmatmul.mubr.msk.bf16.vlgmr.msra.gmra.mxu0 %vm1035_vm12, %v1262_v7  ;;  %v1242_v24 = vsel %vm3469_vm7, %v1226_v11, 0.0  ;;  %v2934_v9 = vld [vmem:[%s4039_s4 + $0x30] sm:$0xff]  }
 0x1f0   : > { %vm3475_vm8 = vmand %vm1181_vm5, %vm1197_vm9  ;;  %v2792_v17 = vpop.f32.mrf.mxu1  ;;  %vm1183_vm5 = vcmp.ge.s32.totalorder %v2542_v27, 0 }
 0x1f1   : > { %vm1195_vm15 = vcmp.gt.f32.partialorder %v1114_v14, 0.0  ;;  %v1227_v18 = vmul.f32 2.0, %v1114_v14  ;;  %v1245_v20 = vsel %vm3475_vm8, %v1229_v13, 0.0  ;;  %v1135_v21 = vadd.f32 %v2792_v17, %v3433_v36  ;;  %v2565_v13 = vld [vmem:[%s3276_s19 + $0x100] sm:$0xff]  ;;  %v2567_v17 = vld [vmem:[%s3276_s19 + $0x110] sm:$0xff] }
 0x1f2   : > { %vm1211_vm11 = vmand %vm1179_vm6, %vm1195_vm15  ;;  %v1126_v22 = vpop.f32.mrf.mxu1  ;;  %v1264_v31 = vpack.c.bf16 %v1245_v20, %v1244_v28 }
 0x1f3   : > { %v1243_v25 = vsel %vm1211_vm11, %v1227_v18, 0.0  ;;  %v1127_v60 = vadd.f32 %v3433_v36, %v1126_v22  ;;  %vm1200_vm0 = vcmp.gt.f32.partialorder %v1135_v21, 0.0  ;;  %v1232_v39 = vmul.f32 2.0, %v1135_v21  ;;  %v2566_v18 = vld [vmem:[%s3276_s19 + $0x108] sm:$0xff]  ;;  %v2580_v22 = vld [vmem:[%s3276_s19 + $0x178] sm:$0xff] }
 0x1f4   : > { %v1263_v29 = vpack.c.bf16 %v1243_v25, %v1242_v24  ;;  %v2793_v30 = vpop.f32.mrf.mxu1  ;;  %vm3508_vm7 = vmand %vm1184_vm4, %vm1200_vm0  ;;  %vm1189_vm11 = vcmp.ge.s32.totalorder %v2548_v48, 0 }
 0x1f5   : > { %vm1198_vm2 = vcmp.gt.f32.partialorder %v1127_v60, 0.0  ;;  %v1138_v32 = vadd.f32 %v2793_v30, %v3433_v36  ;;  %v1230_v35 = vmul.f32 2.0, %v1127_v60  ;;  %v1248_v54 = vsel %vm3508_vm7, %v1232_v39, 0.0  ;;  %v2569_v30 = vld [vmem:[%s3276_s19 + $0x120] sm:$0xff]  ;;  %v2578_v60 = vld [vmem:[%s3276_s19 + $0x168] sm:$0xff] }
 0x1f6   : > { %v1129_v33 = vpop.f32.mrf.mxu1  ;;  %2806 = vmatprep.mubr.msk.bf16.mxu0 %vm1035_vm12, %v1263_v29  ;;  %vm3498_vm13 = vmand %vm1182_vm1, %vm1198_vm2  ;;  %vm1188_vm1 = vcmp.ge.s32.totalorder %v2547_v51, 0  ;;  %vm1425_vm7 = vcmp.ge.s32.totalorder %v2565_v13, 0 }
 0x1f7   : > { %vm1201_vm10 = vcmp.gt.f32.partialorder %v1138_v32, 0.0  ;;  %v1233_v37 = vmul.f32 2.0, %v1138_v32  ;;  %v1130_v38 = vadd.f32 %v3433_v36, %v1129_v33  ;;  %2807 = vmatmul.mubr.msk.bf16.gmra.mxu0 %vm1035_vm12, %v1264_v31  ;;  %v1246_v49 = vsel %vm3498_vm13, %v1230_v35, 0.0 }
 0x1f8   : > { %vm3504_vm6 = vmand %vm1185_vm3, %vm1201_vm10  ;;  %v2796_v41 = vpop.f32.mrf.mxu1  ;;  %vm1187_vm3 = vcmp.ge.s32.totalorder %v2546_v53, 0 }
 0x1f9   : > { %vm1199_vm9 = vcmp.gt.f32.partialorder %v1130_v38, 0.0  ;;  %v1231_v43 = vmul.f32 2.0, %v1130_v38  ;;  %v1249_v45 = vsel %vm3504_vm6, %v1233_v37, 0.0  ;;  %v1151_v46 = vadd.f32 %v2796_v41, %v3433_v36  ;;  %v2571_v38 = vld [vmem:[%s3276_s19 + $0x130] sm:$0xff] }
 0x1fa   : > { %vm1215_vm8 = vmand %vm1183_vm5, %vm1199_vm9  ;;  %v1142_v47 = vpop.f32.mrf.mxu1  ;;  %v1266_v57 = vpack.c.bf16 %v1249_v45, %v1248_v54 }
 0x1fb   : > { %v1247_v50 = vsel %vm1215_vm8, %v1231_v43, 0.0  ;;  %v1143_v52 = vadd.f32 %v3433_v36, %v1142_v47  ;;  %vm1204_vm2 = vcmp.gt.f32.partialorder %v1151_v46, 0.0  ;;  %v1236_v1 = vmul.f32 2.0, %v1151_v46  ;;  %v3659_v47 = vld [vmem:[%s4040_s5 + $0x2] ss:$0 sm:$0xff] }
 0x1fc   : > { %v1265_v55 = vpack.c.bf16 %v1247_v50, %v1246_v49  ;;  %v2797_v56 = vpop.f32.mrf.mxu1  ;;  %vm1220_vm13 = vmand %vm1188_vm1, %vm1204_vm2  ;;  %vm1428_vm8 = vcmp.ge.s32.totalorder %v2568_v16, 0 }
 0x1fd   : > { %vm1202_vm15 = vcmp.gt.f32.partialorder %v1143_v52, 0.0  ;;  %v1154_v58 = vadd.f32 %v2797_v56, %v3433_v36  ;;  %v1234_v62 = vmul.f32 2.0, %v1143_v52  ;;  %v1252_v6 = vsel %vm1220_vm13, %v1236_v1, 0.0  ;;  %v2573_v56 = vld [vmem:[%s3276_s19 + $0x140] sm:$0xff]  ;;  %v2600_v52 = vld [vmem:[%s3276_s19 + $0x198] sm:$0xff] }
 0x1fe   : > { %v1145_v59 = vpop.f32.mrf.mxu1  ;;  %2810 = vmatprep.mubr.msk.bf16.mxu0 %vm1035_vm12, %v1265_v55  ;;  %vm3527_vm4 = vmand %vm1186_vm14, %vm1202_vm15  ;;  %vm1427_vm14 = vcmp.ge.s32.totalorder %v2567_v17, 0  ;;  %vm1429_vm13 = vcmp.ge.s32.totalorder %v2569_v30, 0 }
 0x1ff   : > { %vm1205_vm0 = vcmp.gt.f32.partialorder %v1154_v58, 0.0  ;;  %v1237_v63 = vmul.f32 2.0, %v1154_v58  ;;  %v1146_v0 = vadd.f32 %v3433_v36, %v1145_v59  ;;  %2811 = vmatmul.mubr.msk.bf16.gmra.mxu0 %vm1035_vm12, %v1266_v57  ;;  %v1250_v4 = vsel %vm3527_vm4, %v1234_v62, 0.0  ;;  %v2933_v36 = vld [vmem:[%s4039_s4 + $0x38] sm:$0xff]  }
 0x200   : > { %vm1221_vm5 = vmand %vm1189_vm11, %vm1205_vm0  ;;  %2838 = vmatprep.subr.bf16.mxu0 %v2933_v36  ;;  %vm1426_vm11 = vcmp.ge.s32.totalorder %v2566_v18, 0  ;;  %v2577_v18 = vld [vmem:[%s3276_s19 + $0x160] sm:$0xff] }
 0x201   : > { %vm1203_vm10 = vcmp.gt.f32.partialorder %v1146_v0, 0.0  ;;  %v1235_v2 = vmul.f32 2.0, %v1146_v0  ;;  %v1253_v3 = vsel %vm1221_vm5, %v1237_v63, 0.0  ;;  %2839 = vmatpush3.bf16.msra.mxu0 %v2933_v36  ;;  %v2575_v0 = vld [vmem:[%s3276_s19 + $0x150] sm:$0xff]  ;;  %v2604_v36 = vld [vmem:[%s3276_s19 + $0x1b8] sm:$0xff] }
 0x202   : > { %vm1219_vm6 = vmand %vm1187_vm3, %vm1203_vm10  ;;  %v1268_v8 = vpack.c.bf16 %v1253_v3, %v1252_v6  ;;  %2840 = vmatprep.subr.bf16.mxu0 %v2934_v9 }
 0x203   : > { %v1251_v5 = vsel %vm1219_vm6, %v1235_v2, 0.0  ;;  %vm1432_vm6 = vcmp.ge.s32.totalorder %v2572_v34, 0  ;;  %v2574_v2 = vld [vmem:[%s3276_s19 + $0x148] sm:$0xff] }
 0x204   : > { %v1267_v7 = vpack.c.bf16 %v1251_v5, %v1250_v4 }
 0x205   : > { %2841 = vmatpush3.bf16.msra.mxu0 %v2934_v9 }
 0x206   : > { %2814 = vmatprep.mubr.msk.bf16.mxu0 %vm1035_vm12, %v1267_v7 }
 0x207   : > { %2815 = vmatmul.mubr.msk.bf16.gmra.mxu0 %vm1035_vm12, %v1268_v8 }
 0x2af   : > { %v2804_v11 = vpop.f32.mrf.mxu0 }
 0x2b0   : > { %v1354_v14 = vadd.f32 %v2804_v11, %v3546_v10 }
 0x2b1   : > { %v1345_v15 = vpop.f32.mrf.mxu0 }
 0x2b2   : > { %v1346_v12 = vadd.f32 %v3546_v10, %v1345_v15  ;;  %vm1443_vm15 = vcmp.gt.f32.partialorder %v1354_v14, 0.0  ;;  %v1475_v26 = vmul.f32 2.0, %v1354_v14  ;;  %v2602_v15 = vld [vmem:[%s3276_s19 + $0x1a8] sm:$0xff] }
 0x2b3   : > { %v2805_v19 = vpop.f32.mrf.mxu0  ;;  %vm3564_vm4 = vmand %vm1427_vm14, %vm1443_vm15 }
 0x2b4   : > { %vm1441_vm9 = vcmp.gt.f32.partialorder %v1346_v12, 0.0  ;;  %v1357_v20 = vadd.f32 %v2805_v19, %v3546_v10  ;;  %v1473_v23 = vmul.f32 2.0, %v1346_v12  ;;  %v1491_v41 = vsel %vm3564_vm4, %v1475_v26, 0.0 }
 0x2b5   : > { %v1348_v21 = vpop.f32.mrf.mxu0  ;;  %vm3555_vm1 = vmand %vm1425_vm7, %vm1441_vm9  ;;  %vm1431_vm7 = vcmp.ge.s32.totalorder %v2571_v38, 0  ;;  %vm1433_vm4 = vcmp.ge.s32.totalorder %v2573_v56, 0 }
 0x2b6   : > { %vm1444_vm2 = vcmp.gt.f32.partialorder %v1357_v20, 0.0  ;;  %v1476_v24 = vmul.f32 2.0, %v1357_v20  ;;  %v1349_v25 = vadd.f32 %v3546_v10, %v1348_v21  ;;  %v1489_v35 = vsel %vm3555_vm1, %v1473_v23, 0.0 }
 0x2b7   : > { %vm3560_vm3 = vmand %vm1428_vm8, %vm1444_vm2  ;;  %v2808_v27 = vpop.f32.mrf.mxu0  ;;  %vm1430_vm8 = vcmp.ge.s32.totalorder %v2570_v40, 0 }
 0x2b8   : > { %vm1442_vm0 = vcmp.gt.f32.partialorder %v1349_v25, 0.0  ;;  %v1474_v29 = vmul.f32 2.0, %v1349_v25  ;;  %v1492_v31 = vsel %vm3560_vm3, %v1476_v24, 0.0  ;;  %v1370_v32 = vadd.f32 %v2808_v27, %v3546_v10  ;;  %v2579_v25 = vld [vmem:[%s3276_s19 + $0x170] sm:$0xff] }
 0x2b9   : > { %vm1458_vm5 = vmand %vm1426_vm11, %vm1442_vm0  ;;  %v1361_v33 = vpop.f32.mrf.mxu0  ;;  %v1513_v44 = vpack.c.bf16 %v1492_v31, %v1491_v41 }
 0x2ba   : > { %v1490_v37 = vsel %vm1458_vm5, %v1474_v29, 0.0  ;;  %v1362_v39 = vadd.f32 %v3546_v10, %v1361_v33  ;;  %vm1447_vm9 = vcmp.gt.f32.partialorder %v1370_v32, 0.0  ;;  %v1479_v51 = vmul.f32 2.0, %v1370_v32  ;;  %v2608_v33 = vld [vmem:[%s3276_s19 + $0x1d8] sm:$0xff] }
 0x2bb   : > { %v1512_v42 = vpack.c.bf16 %v1490_v37, %v1489_v35  ;;  %v2809_v43 = vpop.f32.mrf.mxu0  ;;  %vm3592_vm1 = vmand %vm1431_vm7, %vm1447_vm9  ;;  %vm1436_vm5 = vcmp.ge.s32.totalorder %v2576_v61, 0 }
 0x2bc   : > { %vm1445_vm10 = vcmp.gt.f32.partialorder %v1362_v39, 0.0  ;;  %v1373_v45 = vadd.f32 %v2809_v43, %v3546_v10  ;;  %v1477_v48 = vmul.f32 2.0, %v1362_v39  ;;  %v1495_v3 = vsel %vm3592_vm1, %v1479_v51, 0.0 }
 0x2bd   : > { %v1364_v46 = vpop.f32.mrf.mxu0  ;;  %2822 = vmatprep.mubr.msk.bf16.mxu1 %vm1035_vm12, %v1512_v42  ;;  %vm3582_vm14 = vmand %vm1429_vm13, %vm1445_vm10  ;;  %vm1435_vm13 = vcmp.ge.s32.totalorder %v2575_v0, 0  ;;  %vm1437_vm1 = vcmp.ge.s32.totalorder %v2577_v18, 0 }
 0x2be   : > { %vm1448_vm15 = vcmp.gt.f32.partialorder %v1373_v45, 0.0  ;;  %v1480_v49 = vmul.f32 2.0, %v1373_v45  ;;  %v1365_v50 = vadd.f32 %v3546_v10, %v1364_v46  ;;  %2823 = vmatmul.mubr.msk.bf16.vlgmr.msra.gmra.mxu1 %vm1035_vm12, %v1513_v44  ;;  %v1493_v62 = vsel %vm3582_vm14, %v1477_v48, 0.0  ;;  %v2936_v46 = vld [vmem:[%s4039_s4 + $0x40] sm:$0xff]  }
 0x2bf   : > { %vm3588_vm11 = vmand %vm1432_vm6, %vm1448_vm15  ;;  %v2812_v53 = vpop.f32.mrf.mxu0  ;;  %vm1434_vm6 = vcmp.ge.s32.totalorder %v2574_v2, 0 }
 0x2c0   : > { %vm1446_vm2 = vcmp.gt.f32.partialorder %v1365_v50, 0.0  ;;  %v1478_v55 = vmul.f32 2.0, %v1365_v50  ;;  %v1496_v57 = vsel %vm3588_vm11, %v1480_v49, 0.0  ;;  %v1386_v58 = vadd.f32 %v2812_v53, %v3546_v10  ;;  %v2597_v49 = vld [vmem:[%s3276_s19 + $0x180] sm:$0xff]  ;;  %v2599_v53 = vld [vmem:[%s3276_s19 + $0x190] sm:$0xff] }
 0x2c1   : > { %vm1462_vm3 = vmand %vm1430_vm8, %vm1446_vm2  ;;  %v1377_v59 = vpop.f32.mrf.mxu0  ;;  %v1515_v6 = vpack.c.bf16 %v1496_v57, %v1495_v3 }
 0x2c2   : > { %v1494_v63 = vsel %vm1462_vm3, %v1478_v55, 0.0  ;;  %v1378_v1 = vadd.f32 %v3546_v10, %v1377_v59  ;;  %vm1451_vm10 = vcmp.gt.f32.partialorder %v1386_v58, 0.0  ;;  %v1483_v14 = vmul.f32 2.0, %v1386_v58  ;;  %v2598_v55 = vld [vmem:[%s3276_s19 + $0x188] sm:$0xff]  ;;  %v2612_v59 = vld [vmem:[%s3276_s19 + $0x1f8] sm:$0xff] }
 0x2c3   : > { %v1514_v4 = vpack.c.bf16 %v1494_v63, %v1493_v62  ;;  %v2813_v5 = vpop.f32.mrf.mxu0  ;;  %vm3621_vm14 = vmand %vm1435_vm13, %vm1451_vm10  ;;  %vm1440_vm3 = vcmp.ge.s32.totalorder %v2580_v22, 0 }
 0x2c4   : > { %vm1449_vm0 = vcmp.gt.f32.partialorder %v1378_v1, 0.0  ;;  %v1389_v7 = vadd.f32 %v2813_v5, %v3546_v10  ;;  %v1481_v9 = vmul.f32 2.0, %v1378_v1  ;;  %v1499_v27 = vsel %vm3621_vm14, %v1483_v14, 0.0  ;;  %v2601_v5 = vld [vmem:[%s3276_s19 + $0x1a0] sm:$0xff]  ;;  %v2610_v1 = vld [vmem:[%s3276_s19 + $0x1e8] sm:$0xff] }
 0x2c5   : > { %v1380_v8 = vpop.f32.mrf.mxu0  ;;  %2826 = vmatprep.mubr.msk.bf16.mxu1 %vm1035_vm12, %v1514_v4  ;;  %vm3611_vm7 = vmand %vm1433_vm4, %vm1449_vm0  ;;  %vm1439_vm4 = vcmp.ge.s32.totalorder %v2579_v25, 0  ;;  %vm1676_vm14 = vcmp.ge.s32.totalorder %v2597_v49, 0 }
 0x2c6   : > { %vm1452_vm9 = vcmp.gt.f32.partialorder %v1389_v7, 0.0  ;;  %v1484_v11 = vmul.f32 2.0, %v1389_v7  ;;  %v1381_v13 = vadd.f32 %v3546_v10, %v1380_v8  ;;  %2827 = vmatmul.mubr.msk.bf16.gmra.mxu1 %vm1035_vm12, %v1515_v6  ;;  %v1497_v23 = vsel %vm3611_vm7, %v1481_v9, 0.0 }
 0x2c7   : > { %vm3617_vm8 = vmand %vm1436_vm5, %vm1452_vm9  ;;  %v2816_v16 = vpop.f32.mrf.mxu0  ;;  %vm1438_vm5 = vcmp.ge.s32.totalorder %v2578_v60, 0 }
 0x2c8   : > { %vm1450_vm15 = vcmp.gt.f32.partialorder %v1381_v13, 0.0  ;;  %v1482_v12 = vmul.f32 2.0, %v1381_v13  ;;  %v1500_v19 = vsel %vm3617_vm8, %v1484_v11, 0.0  ;;  %v1402_v20 = vadd.f32 %v2816_v16, %v3546_v10  ;;  %v2603_v13 = vld [vmem:[%s3276_s19 + $0x1b0] sm:$0xff] }
 0x2c9   : > { %vm1466_vm11 = vmand %vm1434_vm6, %vm1450_vm15  ;;  %v1393_v21 = vpop.f32.mrf.mxu0  ;;  %v1517_v30 = vpack.c.bf16 %v1500_v19, %v1499_v27 }
 0x2ca   : > { %v1498_v24 = vsel %vm1466_vm11, %v1482_v12, 0.0  ;;  %v1394_v26 = vadd.f32 %v3546_v10, %v1393_v21  ;;  %vm1455_vm0 = vcmp.gt.f32.partialorder %v1402_v20, 0.0  ;;  %v1487_v38 = vmul.f32 2.0, %v1402_v20  ;;  %v3772_v21 = vld [vmem:[%s4040_s5 + $0x3] ss:$0 sm:$0xff] }
 0x2cb   : > { %v1516_v28 = vpack.c.bf16 %v1498_v24, %v1497_v23  ;;  %v2817_v29 = vpop.f32.mrf.mxu0  ;;  %vm1471_vm7 = vmand %vm1439_vm4, %vm1455_vm0  ;;  %vm1679_vm11 = vcmp.ge.s32.totalorder %v2600_v52, 0 }
 0x2cc   : > { %vm1453_vm2 = vcmp.gt.f32.partialorder %v1394_v26, 0.0  ;;  %v1405_v31 = vadd.f32 %v2817_v29, %v3546_v10  ;;  %v1485_v34 = vmul.f32 2.0, %v1394_v26  ;;  %v1503_v43 = vsel %vm1471_vm7, %v1487_v38, 0.0  ;;  %v2605_v29 = vld [vmem:[%s3276_s19 + $0x1c0] sm:$0xff]  ;;  %v2632_v26 = vld [vmem:[%s3276_s19 + $0x218] sm:$0xff] }
 0x2cd   : > { %v1396_v32 = vpop.f32.mrf.mxu0  ;;  %2830 = vmatprep.mubr.msk.bf16.mxu1 %vm1035_vm12, %v1516_v28  ;;  %vm3640_vm13 = vmand %vm1437_vm1, %vm1453_vm2  ;;  %vm1678_vm1 = vcmp.ge.s32.totalorder %v2599_v53, 0  ;;  %vm1680_vm7 = vcmp.ge.s32.totalorder %v2601_v5, 0 }
 0x2ce   : > { %vm1456_vm10 = vcmp.gt.f32.partialorder %v1405_v31, 0.0  ;;  %v1488_v35 = vmul.f32 2.0, %v1405_v31  ;;  %v1397_v37 = vadd.f32 %v3546_v10, %v1396_v32  ;;  %2831 = vmatmul.mubr.msk.bf16.gmra.mxu1 %vm1035_vm12, %v1517_v30  ;;  %v1501_v41 = vsel %vm3640_vm13, %v1485_v34, 0.0  ;;  %v2935_v10 = vld [vmem:[%s4039_s4 + $0x48] sm:$0xff]  }
 0x2cf   : > { %vm1472_vm6 = vmand %vm1440_vm3, %vm1456_vm10  ;;  %2858 = vmatprep.subr.bf16.mxu1 %v2935_v10  ;;  %vm1677_vm3 = vcmp.ge.s32.totalorder %v2598_v55, 0  ;;  %v2609_v55 = vld [vmem:[%s3276_s19 + $0x1e0] sm:$0xff] }
 0x2d0   : > { %vm1454_vm9 = vcmp.gt.f32.partialorder %v1397_v37, 0.0  ;;  %v1486_v39 = vmul.f32 2.0, %v1397_v37  ;;  %v1504_v40 = vsel %vm1472_vm6, %v1488_v35, 0.0  ;;  %2859 = vmatpush3.bf16.msra.mxu1 %v2935_v10  ;;  %v2607_v37 = vld [vmem:[%s3276_s19 + $0x1d0] sm:$0xff]  ;;  %v2636_v10 = vld [vmem:[%s3276_s19 + $0x238] sm:$0xff] }
 0x2d1   : > { %vm1470_vm8 = vmand %vm1438_vm5, %vm1454_vm9  ;;  %v1519_v45 = vpack.c.bf16 %v1504_v40, %v1503_v43  ;;  %2860 = vmatprep.subr.bf16.mxu1 %v2936_v46 }
 0x2d2   : > { %v1502_v42 = vsel %vm1470_vm8, %v1486_v39, 0.0  ;;  %vm1683_vm8 = vcmp.ge.s32.totalorder %v2604_v36, 0  ;;  %v2606_v39 = vld [vmem:[%s3276_s19 + $0x1c8] sm:$0xff] }
 0x2d3   : > { %v1518_v44 = vpack.c.bf16 %v1502_v42, %v1501_v41 }
 0x2d4   : > { %2861 = vmatpush3.bf16.msra.mxu1 %v2936_v46 }
 0x2d5   : > { %2834 = vmatprep.mubr.msk.bf16.mxu1 %vm1035_vm12, %v1518_v44 }
 0x2d6   : > { %2835 = vmatmul.mubr.msk.bf16.gmra.mxu1 %vm1035_vm12, %v1519_v45 }
 0x37e   : > { %v2824_v48 = vpop.f32.mrf.mxu1 }
 0x37f   : > { %v1605_v50 = vadd.f32 %v2824_v48, %v3659_v47 }
 0x380   : > { %v1596_v51 = vpop.f32.mrf.mxu1 }
 0x381   : > { %v1597_v54 = vadd.f32 %v3659_v47, %v1596_v51  ;;  %vm1694_vm2 = vcmp.gt.f32.partialorder %v1605_v50, 0.0  ;;  %v1726_v0 = vmul.f32 2.0, %v1605_v50  ;;  %v2634_v51 = vld [vmem:[%s3276_s19 + $0x228] sm:$0xff] }
 0x382   : > { %v2825_v56 = vpop.f32.mrf.mxu1  ;;  %vm3677_vm13 = vmand %vm1678_vm1, %vm1694_vm2 }
 0x383   : > { %vm1692_vm15 = vcmp.gt.f32.partialorder %v1597_v54, 0.0  ;;  %v1608_v57 = vadd.f32 %v2825_v56, %v3659_v47  ;;  %v1724_v61 = vmul.f32 2.0, %v1597_v54  ;;  %v1742_v16 = vsel %vm3677_vm13, %v1726_v0, 0.0 }
 0x384   : > { %v1599_v58 = vpop.f32.mrf.mxu1  ;;  %vm3668_vm4 = vmand %vm1676_vm14, %vm1692_vm15  ;;  %vm1682_vm14 = vcmp.ge.s32.totalorder %v2603_v13, 0  ;;  %vm1684_vm13 = vcmp.ge.s32.totalorder %v2605_v29, 0 }
 0x385   : > { %vm1695_vm0 = vcmp.gt.f32.partialorder %v1608_v57, 0.0  ;;  %v1727_v62 = vmul.f32 2.0, %v1608_v57  ;;  %v1600_v63 = vadd.f32 %v3659_v47, %v1599_v58  ;;  %v1740_v9 = vsel %vm3668_vm4, %v1724_v61, 0.0 }
 0x386   : > { %vm3673_vm5 = vmand %vm1679_vm11, %vm1695_vm0  ;;  %v2828_v2 = vpop.f32.mrf.mxu1  ;;  %vm1681_vm11 = vcmp.ge.s32.totalorder %v2602_v15, 0 }
 0x387   : > { %vm1693_vm10 = vcmp.gt.f32.partialorder %v1600_v63, 0.0  ;;  %v1725_v4 = vmul.f32 2.0, %v1600_v63  ;;  %v1743_v6 = vsel %vm3673_vm5, %v1727_v62, 0.0  ;;  %v1621_v7 = vadd.f32 %v2828_v2, %v3659_v47  ;;  %v2611_v63 = vld [vmem:[%s3276_s19 + $0x1f0] sm:$0xff] }
 0x388   : > { %vm1709_vm6 = vmand %vm1677_vm3, %vm1693_vm10  ;;  %v1612_v8 = vpop.f32.mrf.mxu1  ;;  %v1764_v18 = vpack.c.bf16 %v1743_v6, %v1742_v16 }
 0x389   : > { %v1741_v11 = vsel %vm1709_vm6, %v1725_v4, 0.0  ;;  %v1613_v14 = vadd.f32 %v3659_v47, %v1612_v8  ;;  %vm1698_vm15 = vcmp.gt.f32.partialorder %v1621_v7, 0.0  ;;  %v1730_v25 = vmul.f32 2.0, %v1621_v7  ;;  %v2640_v8 = vld [vmem:[%s3276_s19 + $0x258] sm:$0xff] }
 0x38a   : > { %v1763_v17 = vpack.c.bf16 %v1741_v11, %v1740_v9  ;;  %v2829_v12 = vpop.f32.mrf.mxu1  ;;  %vm3705_vm4 = vmand %vm1682_vm14, %vm1698_vm15  ;;  %vm1687_vm6 = vcmp.ge.s32.totalorder %v2608_v33, 0 }
 0x38b   : > { %vm1696_vm9 = vcmp.gt.f32.partialorder %v1613_v14, 0.0  ;;  %v1624_v19 = vadd.f32 %v2829_v12, %v3659_v47  ;;  %v1728_v22 = vmul.f32 2.0, %v1613_v14  ;;  %v1746_v40 = vsel %vm3705_vm4, %v1730_v25, 0.0 }
 0x38c   : > { %v1615_v20 = vpop.f32.mrf.mxu1  ;;  %2842 = vmatprep.mubr.msk.bf16.mxu0 %vm1035_vm12, %v1763_v17  ;;  %vm3695_vm1 = vmand %vm1680_vm7, %vm1696_vm9  ;;  %vm1686_vm7 = vcmp.ge.s32.totalorder %v2607_v37, 0  ;;  %vm1688_vm4 = vcmp.ge.s32.totalorder %v2609_v55, 0 }
 0x38d   : > { %vm1699_vm2 = vcmp.gt.f32.partialorder %v1624_v19, 0.0  ;;  %v1731_v23 = vmul.f32 2.0, %v1624_v19  ;;  %v1616_v24 = vadd.f32 %v3659_v47, %v1615_v20  ;;  %2843 = vmatmul.mubr.msk.bf16.vlgmr.msra.gmra.mxu0 %vm1035_vm12, %v1764_v18  ;;  %v1744_v34 = vsel %vm3695_vm1, %v1728_v22, 0.0  ;;  %v2938_v20 = vld [vmem:[%s4041_s6] sm:$0xff]  }
 0x38e   : > { %vm3701_vm3 = vmand %vm1683_vm8, %vm1699_vm2  ;;  %v2832_v60 = vpop.f32.mrf.mxu1  ;;  %vm1685_vm8 = vcmp.ge.s32.totalorder %v2606_v39, 0 }
 0x38f   : > { %vm1697_vm0 = vcmp.gt.f32.partialorder %v1616_v24, 0.0  ;;  %v1729_v28 = vmul.f32 2.0, %v1616_v24  ;;  %v1747_v30 = vsel %vm3701_vm3, %v1731_v23, 0.0  ;;  %v1637_v31 = vadd.f32 %v2832_v60, %v3659_v47  ;;  %v2629_v23 = vld [vmem:[%s3276_s19 + $0x200] sm:$0xff]  ;;  %v2631_v60 = vld [vmem:[%s3276_s19 + $0x210] sm:$0xff] }
 0x390   : > { %vm1713_vm5 = vmand %vm1681_vm11, %vm1697_vm0  ;;  %v1628_v32 = vpop.f32.mrf.mxu1  ;;  %v1766_v43 = vpack.c.bf16 %v1747_v30, %v1746_v40 }
 0x391   : > { %v1745_v35 = vsel %vm1713_vm5, %v1729_v28, 0.0  ;;  %v1629_v38 = vadd.f32 %v3659_v47, %v1628_v32  ;;  %vm1702_vm9 = vcmp.gt.f32.partialorder %v1637_v31, 0.0  ;;  %v1734_v50 = vmul.f32 2.0, %v1637_v31  ;;  %v2630_v28 = vld [vmem:[%s3276_s19 + $0x208] sm:$0xff]  ;;  %v2644_v32 = vld [vmem:[%s3276_s19 + $0x278] sm:$0xff] }
 0x392   : > { %v1765_v41 = vpack.c.bf16 %v1745_v35, %v1744_v34  ;;  %v2833_v42 = vpop.f32.mrf.mxu1  ;;  %vm3734_vm1 = vmand %vm1686_vm7, %vm1702_vm9  ;;  %vm1691_vm5 = vcmp.ge.s32.totalorder %v2612_v59, 0 }
 0x393   : > { %vm1700_vm10 = vcmp.gt.f32.partialorder %v1629_v38, 0.0  ;;  %v1640_v44 = vadd.f32 %v2833_v42, %v3659_v47  ;;  %v1732_v46 = vmul.f32 2.0, %v1629_v38  ;;  %v1750_v2 = vsel %vm3734_vm1, %v1734_v50, 0.0  ;;  %v2633_v42 = vld [vmem:[%s3276_s19 + $0x220] sm:$0xff]  ;;  %v2642_v38 = vld [vmem:[%s3276_s19 + $0x268] sm:$0xff] }
 0x394   : > { %v1631_v45 = vpop.f32.mrf.mxu1  ;;  %2846 = vmatprep.mubr.msk.bf16.mxu0 %vm1035_vm12, %v1765_v41  ;;  %vm3724_vm14 = vmand %vm1684_vm13, %vm1700_vm10  ;;  %vm1690_vm13 = vcmp.ge.s32.totalorder %v2611_v63, 0  ;;  %vm1927_vm1 = vcmp.ge.s32.totalorder %v2629_v23, 0 }
 0x395   : > { %vm1703_vm15 = vcmp.gt.f32.partialorder %v1640_v44, 0.0  ;;  %v1735_v48 = vmul.f32 2.0, %v1640_v44  ;;  %v1632_v49 = vadd.f32 %v3659_v47, %v1631_v45  ;;  %2847 = vmatmul.mubr.msk.bf16.gmra.mxu0 %vm1035_vm12, %v1766_v43  ;;  %v1748_v61 = vsel %vm3724_vm14, %v1732_v46, 0.0 }
 0x396   : > { %vm3730_vm11 = vmand %vm1687_vm6, %vm1703_vm15  ;;  %v2836_v52 = vpop.f32.mrf.mxu1  ;;  %vm1689_vm6 = vcmp.ge.s32.totalorder %v2610_v1, 0 }
 0x397   : > { %vm1701_vm2 = vcmp.gt.f32.partialorder %v1632_v49, 0.0  ;;  %v1733_v54 = vmul.f32 2.0, %v1632_v49  ;;  %v1751_v56 = vsel %vm3730_vm11, %v1735_v48, 0.0  ;;  %v1653_v57 = vadd.f32 %v2836_v52, %v3659_v47  ;;  %v2635_v49 = vld [vmem:[%s3276_s19 + $0x230] sm:$0xff] }
 0x398   : > { %vm1717_vm3 = vmand %vm1685_vm8, %vm1701_vm2  ;;  %v1644_v58 = vpop.f32.mrf.mxu1  ;;  %v1768_v5 = vpack.c.bf16 %v1751_v56, %v1750_v2 }
 0x399   : > { %v1749_v62 = vsel %vm1717_vm3, %v1733_v54, 0.0  ;;  %v1645_v0 = vadd.f32 %v3659_v47, %v1644_v58  ;;  %vm1706_vm10 = vcmp.gt.f32.partialorder %v1653_v57, 0.0  ;;  %v1738_v13 = vmul.f32 2.0, %v1653_v57  ;;  %v2661_v58 = vld [vmem:[%s3276_s19 + $0x280] sm:$0xff] }
 0x39a   : > { %v1767_v3 = vpack.c.bf16 %v1749_v62, %v1748_v61  ;;  %v2837_v4 = vpop.f32.mrf.mxu1  ;;  %vm1722_vm14 = vmand %vm1690_vm13, %vm1706_vm10  ;;  %vm1930_vm3 = vcmp.ge.s32.totalorder %v2632_v26, 0 }
 0x39b   : > { %vm1704_vm0 = vcmp.gt.f32.partialorder %v1645_v0, 0.0  ;;  %v1656_v6 = vadd.f32 %v2837_v4, %v3659_v47  ;;  %v1736_v36 = vmul.f32 2.0, %v1645_v0  ;;  %v1754_v12 = vsel %vm1722_vm14, %v1738_v13, 0.0  ;;  %v2637_v4 = vld [vmem:[%s3276_s19 + $0x240] sm:$0xff] }
 0x39c   : > { %v1647_v7 = vpop.f32.mrf.mxu1  ;;  %2850 = vmatprep.mubr.msk.bf16.mxu0 %vm1035_vm12, %v1767_v3  ;;  %vm3753_vm7 = vmand %vm1688_vm4, %vm1704_vm0  ;;  %vm1929_vm4 = vcmp.ge.s32.totalorder %v2631_v60, 0  ;;  %vm1931_vm14 = vcmp.ge.s32.totalorder %v2633_v42, 0 }
 0x39d   : > { %vm1707_vm9 = vcmp.gt.f32.partialorder %v1656_v6, 0.0  ;;  %v1739_v9 = vmul.f32 2.0, %v1656_v6  ;;  %v1648_v11 = vadd.f32 %v3659_v47, %v1647_v7  ;;  %2851 = vmatmul.mubr.msk.bf16.gmra.mxu0 %vm1035_vm12, %v1768_v5  ;;  %v1752_v16 = vsel %vm3753_vm7, %v1736_v36, 0.0  ;;  %v2937_v47 = vld [vmem:[%s4041_s6 + $0x8] sm:$0xff]  }
 0x39e   : > { %vm1723_vm8 = vmand %vm1691_vm5, %vm1707_vm9  ;;  %2878 = vmatprep.subr.bf16.mxu0 %v2937_v47  ;;  %vm1928_vm5 = vcmp.ge.s32.totalorder %v2630_v28, 0  ;;  %v2641_v28 = vld [vmem:[%s3276_s19 + $0x260] sm:$0xff] }
 0x39f   : > { %vm1705_vm15 = vcmp.gt.f32.partialorder %v1648_v11, 0.0  ;;  %v1737_v14 = vmul.f32 2.0, %v1648_v11  ;;  %v1755_v15 = vsel %vm1723_vm8, %v1739_v9, 0.0  ;;  %2879 = vmatpush3.bf16.msra.mxu0 %v2937_v47  ;;  %v2639_v11 = vld [vmem:[%s3276_s19 + $0x250] sm:$0xff] }
 0x3a0   : > { %vm1721_vm11 = vmand %vm1689_vm6, %vm1705_vm15  ;;  %v1770_v19 = vpack.c.bf16 %v1755_v15, %v1754_v12  ;;  %2880 = vmatprep.subr.bf16.mxu0 %v2938_v20 }
 0x3a1   : > { %v1753_v17 = vsel %vm1721_vm11, %v1737_v14, 0.0  ;;  %vm1934_vm11 = vcmp.ge.s32.totalorder %v2636_v10, 0  ;;  %v2638_v14 = vld [vmem:[%s3276_s19 + $0x248] sm:$0xff] }
 0x3a2   : > { %v1769_v18 = vpack.c.bf16 %v1753_v17, %v1752_v16 }
 0x3a3   : > { %2881 = vmatpush3.bf16.msra.mxu0 %v2938_v20 }
 0x3a4   : > { %2854 = vmatprep.mubr.msk.bf16.mxu0 %vm1035_vm12, %v1769_v18 }
 0x3a5   : > { %2855 = vmatmul.mubr.msk.bf16.gmra.mxu0 %vm1035_vm12, %v1770_v19 }
 0x44d   : > { %v2844_v22 = vpop.f32.mrf.mxu0 }
 0x44e   : > { %v1856_v24 = vadd.f32 %v2844_v22, %v3772_v21 }
 0x44f   : > { %v1847_v25 = vpop.f32.mrf.mxu0 }
 0x450   : > { %v1848_v27 = vadd.f32 %v3772_v21, %v1847_v25  ;;  %vm1945_vm0 = vcmp.gt.f32.partialorder %v1856_v24, 0.0  ;;  %v1977_v37 = vmul.f32 2.0, %v1856_v24 }
 0x451   : > { %v2845_v29 = vpop.f32.mrf.mxu0  ;;  %vm3790_vm7 = vmand %vm1929_vm4, %vm1945_vm0 }
 0x452   : > { %vm1943_vm2 = vcmp.gt.f32.partialorder %v1848_v27, 0.0  ;;  %v1859_v30 = vadd.f32 %v2845_v29, %v3772_v21  ;;  %v1975_v33 = vmul.f32 2.0, %v1848_v27  ;;  %v1993_v52 = vsel %vm3790_vm7, %v1977_v37, 0.0 }
 0x453   : > { %v1850_v31 = vpop.f32.mrf.mxu0  ;;  %vm3781_vm13 = vmand %vm1927_vm1, %vm1943_vm2  ;;  %vm1933_vm1 = vcmp.ge.s32.totalorder %v2635_v49, 0  ;;  %vm1935_vm7 = vcmp.ge.s32.totalorder %v2637_v4, 0 }
 0x454   : > { %vm1946_vm10 = vcmp.gt.f32.partialorder %v1859_v30, 0.0  ;;  %v1978_v34 = vmul.f32 2.0, %v1859_v30  ;;  %v1851_v35 = vadd.f32 %v3772_v21, %v1850_v31  ;;  %v1991_v46 = vsel %vm3781_vm13, %v1975_v33, 0.0 }
 0x455   : > { %vm3786_vm6 = vmand %vm1930_vm3, %vm1946_vm10  ;;  %v2848_v39 = vpop.f32.mrf.mxu0  ;;  %vm1932_vm3 = vcmp.ge.s32.totalorder %v2634_v51, 0 }
 0x456   : > { %vm1944_vm9 = vcmp.gt.f32.partialorder %v1851_v35, 0.0  ;;  %v1976_v41 = vmul.f32 2.0, %v1851_v35  ;;  %v1994_v43 = vsel %vm3786_vm6, %v1978_v34, 0.0  ;;  %v1872_v44 = vadd.f32 %v2848_v39, %v3772_v21  ;;  %v2643_v35 = vld [vmem:[%s3276_s19 + $0x270] sm:$0xff] }
 0x457   : > { %vm1960_vm8 = vmand %vm1928_vm5, %vm1944_vm9  ;;  %v1863_v45 = vpop.f32.mrf.mxu0  ;;  %v2015_v55 = vpack.c.bf16 %v1994_v43, %v1993_v52 }
 0x458   : > { %v1992_v48 = vsel %vm1960_vm8, %v1976_v41, 0.0  ;;  %v1864_v50 = vadd.f32 %v3772_v21, %v1863_v45  ;;  %vm1949_vm2 = vcmp.gt.f32.partialorder %v1872_v44, 0.0  ;;  %v1981_v63 = vmul.f32 2.0, %v1872_v44 }
 0x459   : > { %v2014_v53 = vpack.c.bf16 %v1992_v48, %v1991_v46  ;;  %v2849_v54 = vpop.f32.mrf.mxu0  ;;  %vm3818_vm13 = vmand %vm1933_vm1, %vm1949_vm2  ;;  %vm1938_vm8 = vcmp.ge.s32.totalorder %v2640_v8, 0 }
 0x45a   : > { %vm1947_vm15 = vcmp.gt.f32.partialorder %v1864_v50, 0.0  ;;  %v1875_v56 = vadd.f32 %v2849_v54, %v3772_v21  ;;  %v1979_v59 = vmul.f32 2.0, %v1864_v50  ;;  %v1997_v15 = vsel %vm3818_vm13, %v1981_v63, 0.0  ;;  %v2663_v63 = vld [vmem:[%s3276_s19 + $0x290] sm:$0xff] }
 0x45b   : > { %v1866_v57 = vpop.f32.mrf.mxu0  ;;  %2862 = vmatprep.mubr.msk.bf16.mxu1 %vm1035_vm12, %v2014_v53  ;;  %vm3808_vm4 = vmand %vm1931_vm14, %vm1947_vm15  ;;  %vm1937_vm14 = vcmp.ge.s32.totalorder %v2639_v11, 0  ;;  %vm1939_vm13 = vcmp.ge.s32.totalorder %v2641_v28, 0 }
 0x45c   : > { %vm1950_vm0 = vcmp.gt.f32.partialorder %v1875_v56, 0.0  ;;  %v1982_v61 = vmul.f32 2.0, %v1875_v56  ;;  %v1867_v62 = vadd.f32 %v3772_v21, %v1866_v57  ;;  %2863 = vmatmul.mubr.msk.bf16.vlgmr.msra.gmra.mxu1 %vm1035_vm12, %v2015_v55  ;;  %v1995_v36 = vsel %vm3808_vm4, %v1979_v59, 0.0  ;;  %v3879_v56 = vld [vmem:[%s4040_s5 + $0x4] ss:$0 sm:$0xff] }
 0x45d   : > { %vm3814_vm5 = vmand %vm1934_vm11, %vm1950_vm0  ;;  %v2852_v1 = vpop.f32.mrf.mxu0  ;;  %vm1936_vm11 = vcmp.ge.s32.totalorder %v2638_v14, 0 }
 0x45e   : > { %vm1948_vm10 = vcmp.gt.f32.partialorder %v1867_v62, 0.0  ;;  %v1980_v3 = vmul.f32 2.0, %v1867_v62  ;;  %v1998_v5 = vsel %vm3814_vm5, %v1982_v61, 0.0  ;;  %v1888_v6 = vadd.f32 %v2852_v1, %v3772_v21  ;;  %v2664_v62 = vld [vmem:[%s3276_s19 + $0x298] sm:$0xff]  ;;  %v2662_v1 = vld [vmem:[%s3276_s19 + $0x288] sm:$0xff] }
 0x45f   : > { %vm1964_vm6 = vmand %vm1932_vm3, %vm1948_vm10  ;;  %v1879_v7 = vpop.f32.mrf.mxu0  ;;  %v2017_v12 = vpack.c.bf16 %v1998_v5, %v1997_v15  ;;  %v2665_v15 = vld [vmem:[%s3276_s19 + $0x2a0] sm:$0xff]  ;;  %v2676_v5 = vld [vmem:[%s3276_s19 + $0x2f8] sm:$0xff] }
 0x460   : > { %v1996_v9 = vsel %vm1964_vm6, %v1980_v3, 0.0  ;;  %v1880_v13 = vadd.f32 %v3772_v21, %v1879_v7  ;;  %vm1953_vm15 = vcmp.gt.f32.partialorder %v1888_v6, 0.0  ;;  %v1985_v24 = vmul.f32 2.0, %v1888_v6 }
 0x461   : > { %v2016_v16 = vpack.c.bf16 %v1996_v9, %v1995_v36  ;;  %v2853_v17 = vpop.f32.mrf.mxu0  ;;  %vm3847_vm4 = vmand %vm1937_vm14, %vm1953_vm15  ;;  %vm1942_vm6 = vcmp.ge.s32.totalorder %v2644_v32, 0  ;;  %v2674_v9 = vld [vmem:[%s3276_s19 + $0x2e8] sm:$0xff] }
 0x462   : > { %vm1951_vm9 = vcmp.gt.f32.partialorder %v1880_v13, 0.0  ;;  %v1891_v18 = vadd.f32 %v2853_v17, %v3772_v21  ;;  %v1983_v20 = vmul.f32 2.0, %v1880_v13  ;;  %v2001_v39 = vsel %vm3847_vm4, %v1985_v24, 0.0 }
 0x463   : > { %v1882_v19 = vpop.f32.mrf.mxu0  ;;  %2866 = vmatprep.mubr.msk.bf16.mxu1 %vm1035_vm12, %v2016_v16  ;;  %vm3837_vm1 = vmand %vm1935_vm7, %vm1951_vm9  ;;  %vm1941_vm7 = vcmp.ge.s32.totalorder %v2643_v35, 0  ;;  %vm2178_vm4 = vcmp.ge.s32.totalorder %v2661_v58, 0 }
 0x464   : > { %vm1954_vm2 = vcmp.gt.f32.partialorder %v1891_v18, 0.0  ;;  %v1986_v22 = vmul.f32 2.0, %v1891_v18  ;;  %v1883_v23 = vadd.f32 %v3772_v21, %v1882_v19  ;;  %2867 = vmatmul.mubr.msk.bf16.gmra.mxu1 %vm1035_vm12, %v2017_v12  ;;  %v1999_v33 = vsel %vm3837_vm1, %v1983_v20, 0.0  ;;  %v2668_v18 = vld [vmem:[%s3276_s19 + $0x2b8] sm:$0xff]  ;;  %v2667_v20 = vld [vmem:[%s3276_s19 + $0x2b0] sm:$0xff] }
 0x465   : > { %vm3843_vm3 = vmand %vm1938_vm8, %vm1954_vm2  ;;  %v2856_v26 = vpop.f32.mrf.mxu0  ;;  %vm1940_vm8 = vcmp.ge.s32.totalorder %v2642_v38, 0 }
 0x466   : > { %vm1952_vm0 = vcmp.gt.f32.partialorder %v1883_v23, 0.0  ;;  %v1984_v27 = vmul.f32 2.0, %v1883_v23  ;;  %v2002_v29 = vsel %vm3843_vm3, %v1986_v22, 0.0  ;;  %v1904_v30 = vadd.f32 %v2856_v26, %v3772_v21  ;;  %v2666_v23 = vld [vmem:[%s3276_s19 + $0x2a8] sm:$0xff] }
 0x467   : > { %vm1968_vm5 = vmand %vm1936_vm11, %vm1952_vm0  ;;  %v1895_v31 = vpop.f32.mrf.mxu0  ;;  %v2019_v42 = vpack.c.bf16 %v2002_v29, %v2001_v39  ;;  %v2669_v39 = vld [vmem:[%s3276_s19 + $0x2c0] sm:$0xff] }
 0x468   : > { %v2000_v34 = vsel %vm1968_vm5, %v1984_v27, 0.0  ;;  %v1896_v37 = vadd.f32 %v3772_v21, %v1895_v31  ;;  %vm1957_vm9 = vcmp.gt.f32.partialorder %v1904_v30, 0.0  ;;  %v1989_v49 = vmul.f32 2.0, %v1904_v30 }
 0x469   : > { %v2018_v40 = vpack.c.bf16 %v2000_v34, %v1999_v33  ;;  %v2857_v41 = vpop.f32.mrf.mxu0  ;;  %vm1973_vm1 = vmand %vm1941_vm7, %vm1957_vm9  ;;  %vm2181_vm5 = vcmp.ge.s32.totalorder %v2664_v62, 0 }
 0x46a   : > { %vm1955_vm10 = vcmp.gt.f32.partialorder %v1896_v37, 0.0  ;;  %v1907_v43 = vadd.f32 %v2857_v41, %v3772_v21  ;;  %v1987_v10 = vmul.f32 2.0, %v1896_v37  ;;  %v2005_v54 = vsel %vm1973_vm1, %v1989_v49, 0.0 }
 0x46b   : > { %v1898_v44 = vpop.f32.mrf.mxu0  ;;  %2870 = vmatprep.mubr.msk.bf16.mxu1 %vm1035_vm12, %v2018_v40  ;;  %vm3866_vm14 = vmand %vm1939_vm13, %vm1955_vm10  ;;  %vm2180_vm13 = vcmp.ge.s32.totalorder %v2663_v63, 0  ;;  %vm2182_vm1 = vcmp.ge.s32.totalorder %v2665_v15, 0 }
 0x46c   : > { %vm1958_vm15 = vcmp.gt.f32.partialorder %v1907_v43, 0.0  ;;  %v1990_v46 = vmul.f32 2.0, %v1907_v43  ;;  %v1899_v48 = vadd.f32 %v3772_v21, %v1898_v44  ;;  %2871 = vmatmul.mubr.msk.bf16.gmra.mxu1 %vm1035_vm12, %v2019_v42  ;;  %v2003_v52 = vsel %vm3866_vm14, %v1987_v10, 0.0  ;;  %v2672_v43 = vld [vmem:[%s3276_s19 + $0x2d8] sm:$0xff]  ;;  %v2671_v10 = vld [vmem:[%s3276_s19 + $0x2d0] sm:$0xff] }
 0x46d   : > { %vm1974_vm11 = vmand %vm1942_vm6, %vm1958_vm15  ;;  %vm2179_vm6 = vcmp.ge.s32.totalorder %v2662_v1, 0  ;;  %v2673_v1 = vld [vmem:[%s3276_s19 + $0x2e0] sm:$0xff] }
 0x46e   : > { %vm1956_vm2 = vcmp.gt.f32.partialorder %v1899_v48, 0.0  ;;  %v1988_v50 = vmul.f32 2.0, %v1899_v48  ;;  %v2006_v51 = vsel %vm1974_vm11, %v1990_v46, 0.0  ;;  %v2670_v48 = vld [vmem:[%s3276_s19 + $0x2c8] sm:$0xff] }
 0x46f   : > { %vm1972_vm3 = vmand %vm1940_vm8, %vm1956_vm2  ;;  %v2021_v21 = vpack.c.bf16 %v2006_v51, %v2005_v54 }
 0x470   : > { %v2004_v53 = vsel %vm1972_vm3, %v1988_v50, 0.0  ;;  %vm2185_vm3 = vcmp.ge.s32.totalorder %v2668_v18, 0 }
 0x471   : > { %v2020_v55 = vpack.c.bf16 %v2004_v53, %v2003_v52 }
 0x473   : > { %2874 = vmatprep.mubr.msk.bf16.mxu1 %vm1035_vm12, %v2020_v55 }
 0x474   : > { %2875 = vmatmul.mubr.msk.bf16.gmra.mxu1 %vm1035_vm12, %v2021_v21 }
 0x51c   : > { %v2864_v57 = vpop.f32.mrf.mxu1 }
 0x51d   : > { %v2107_v59 = vadd.f32 %v2864_v57, %v3879_v56 }
 0x51e   : > { %v2098_v61 = vpop.f32.mrf.mxu1 }
 0x51f   : > { %v2099_v0 = vadd.f32 %v3879_v56, %v2098_v61  ;;  %vm2196_vm10 = vcmp.gt.f32.partialorder %v2107_v59, 0.0  ;;  %v2228_v36 = vmul.f32 2.0, %v2107_v59 }
 0x520   : > { %v2865_v2 = vpop.f32.mrf.mxu1  ;;  %vm3897_vm14 = vmand %vm2180_vm13, %vm2196_vm10 }
 0x521   : > { %vm2194_vm0 = vcmp.gt.f32.partialorder %v2099_v0, 0.0  ;;  %v2110_v3 = vadd.f32 %v2865_v2, %v3879_v56  ;;  %v2226_v6 = vmul.f32 2.0, %v2099_v0  ;;  %v2244_v24 = vsel %vm3897_vm14, %v2228_v36, 0.0 }
 0x522   : > { %v2101_v4 = vpop.f32.mrf.mxu1  ;;  %vm3888_vm7 = vmand %vm2178_vm4, %vm2194_vm0  ;;  %vm2184_vm4 = vcmp.ge.s32.totalorder %v2667_v20, 0  ;;  %vm2186_vm14 = vcmp.ge.s32.totalorder %v2669_v39, 0 }
 0x523   : > { %vm2197_vm9 = vcmp.gt.f32.partialorder %v2110_v3, 0.0  ;;  %v2229_v7 = vmul.f32 2.0, %v2110_v3  ;;  %v2102_v8 = vadd.f32 %v3879_v56, %v2101_v4  ;;  %v2242_v19 = vsel %vm3888_vm7, %v2226_v6, 0.0 }
 0x524   : > { %vm3893_vm8 = vmand %vm2181_vm5, %vm2197_vm9  ;;  %v2868_v11 = vpop.f32.mrf.mxu1  ;;  %vm2183_vm5 = vcmp.ge.s32.totalorder %v2666_v23, 0 }
 0x525   : > { %vm2195_vm15 = vcmp.gt.f32.partialorder %v2102_v8, 0.0  ;;  %v2227_v14 = vmul.f32 2.0, %v2102_v8  ;;  %v2245_v16 = vsel %vm3893_vm8, %v2229_v7, 0.0  ;;  %v2123_v17 = vadd.f32 %v2868_v11, %v3879_v56  ;;  %v2675_v8 = vld [vmem:[%s3276_s19 + $0x2f0] sm:$0xff] }
 0x526   : > { %vm2211_vm11 = vmand %vm2179_vm6, %vm2195_vm15  ;;  %v2114_v12 = vpop.f32.mrf.mxu1  ;;  %v2264_v60 = vpack.c.bf16 %v2245_v16, %v2244_v24 }
 0x527   : > { %v2243_v47 = vsel %vm2211_vm11, %v2227_v14, 0.0  ;;  %v2115_v22 = vadd.f32 %v3879_v56, %v2114_v12  ;;  %vm2200_vm0 = vcmp.gt.f32.partialorder %v2123_v17, 0.0  ;;  %v2232_v33 = vmul.f32 2.0, %v2123_v17 }
 0x528   : > { %v2263_v25 = vpack.c.bf16 %v2243_v47, %v2242_v19  ;;  %v2869_v26 = vpop.f32.mrf.mxu1  ;;  %vm3925_vm7 = vmand %vm2184_vm4, %vm2200_vm0  ;;  %vm2189_vm11 = vcmp.ge.s32.totalorder %v2672_v43, 0 }
 0x529   : > { %vm2198_vm2 = vcmp.gt.f32.partialorder %v2115_v22, 0.0  ;;  %v2126_v27 = vadd.f32 %v2869_v26, %v3879_v56  ;;  %v2230_v30 = vmul.f32 2.0, %v2115_v22  ;;  %v2248_v49 = vsel %vm3925_vm7, %v2232_v33, 0.0 }
 0x52a   : > { %v2117_v28 = vpop.f32.mrf.mxu1  ;;  %2882 = vmatprep.mubr.msk.bf16.mxu0 %vm1035_vm12, %v2263_v25  ;;  %vm3915_vm13 = vmand %vm2182_vm1, %vm2198_vm2  ;;  %vm2188_vm1 = vcmp.ge.s32.totalorder %v2671_v10, 0  ;;  %vm2190_vm7 = vcmp.ge.s32.totalorder %v2673_v1, 0 }
 0x52b   : > { %vm2201_vm10 = vcmp.gt.f32.partialorder %v2126_v27, 0.0  ;;  %v2233_v31 = vmul.f32 2.0, %v2126_v27  ;;  %v2118_v32 = vadd.f32 %v3879_v56, %v2117_v28  ;;  %2883 = vmatmul.mubr.msk.bf16.vlgmr.msra.gmra.mxu0 %vm1035_vm12, %v2264_v60  ;;  %v2246_v44 = vsel %vm3915_vm13, %v2230_v30, 0.0 }
 0x52c   : > { %vm3921_vm6 = vmand %vm2185_vm3, %vm2201_vm10  ;;  %v2872_v35 = vpop.f32.mrf.mxu1  ;;  %vm2187_vm3 = vcmp.ge.s32.totalorder %v2670_v48, 0 }
 0x52d   : > { %vm2199_vm9 = vcmp.gt.f32.partialorder %v2118_v32, 0.0  ;;  %v2231_v38 = vmul.f32 2.0, %v2118_v32  ;;  %v2249_v40 = vsel %vm3921_vm6, %v2233_v31, 0.0  ;;  %v2139_v41 = vadd.f32 %v2872_v35, %v3879_v56 }
 0x52e   : > { %vm2215_vm8 = vmand %vm2183_vm5, %vm2199_vm9  ;;  %v2130_v42 = vpop.f32.mrf.mxu1  ;;  %v2266_v52 = vpack.c.bf16 %v2249_v40, %v2248_v49 }
 0x52f   : > { %v2247_v45 = vsel %vm2215_vm8, %v2231_v38, 0.0  ;;  %v2131_v46 = vadd.f32 %v3879_v56, %v2130_v42  ;;  %vm2204_vm2 = vcmp.gt.f32.partialorder %v2139_v41, 0.0  ;;  %v2236_v59 = vmul.f32 2.0, %v2139_v41 }
 0x530   : > { %v2265_v50 = vpack.c.bf16 %v2247_v45, %v2246_v44  ;;  %v2873_v51 = vpop.f32.mrf.mxu1  ;;  %vm3954_vm13 = vmand %vm2188_vm1, %vm2204_vm2  ;;  %vm2193_vm8 = vcmp.ge.s32.totalorder %v2676_v5, 0 }
 0x531   : > { %vm2202_vm15 = vcmp.gt.f32.partialorder %v2131_v46, 0.0  ;;  %v2142_v53 = vadd.f32 %v2873_v51, %v3879_v56  ;;  %v2234_v21 = vmul.f32 2.0, %v2131_v46  ;;  %v2252_v11 = vsel %vm3954_vm13, %v2236_v59, 0.0 }
 0x532   : > { %v2133_v54 = vpop.f32.mrf.mxu1  ;;  %2886 = vmatprep.mubr.msk.bf16.mxu0 %vm1035_vm12, %v2265_v50  ;;  %vm3944_vm4 = vmand %vm2186_vm14, %vm2202_vm15  ;;  %vm2192_vm14 = vcmp.ge.s32.totalorder %v2675_v8, 0  ;;  %vm2410_vm13 = vcmask 64512  }
 0x533   : > { %vm2205_vm0 = vcmp.gt.f32.partialorder %v2142_v53, 0.0  ;;  %v2237_v57 = vmul.f32 2.0, %v2142_v53  ;;  %v2134_v58 = vadd.f32 %v3879_v56, %v2133_v54  ;;  %2887 = vmatmul.mubr.msk.bf16.gmra.mxu0 %vm1035_vm12, %v2266_v52  ;;  %v2250_v6 = vsel %vm3944_vm4, %v2234_v21, 0.0 }
 0x534   : > { %vm3950_vm5 = vmand %vm2189_vm11, %vm2205_vm0  ;;  %v2876_v62 = vpop.f32.mrf.mxu1  ;;  %vm2191_vm11 = vcmp.ge.s32.totalorder %v2674_v9, 0 }
 0x535   : > { %vm2203_vm10 = vcmp.gt.f32.partialorder %v2134_v58, 0.0  ;;  %v2235_v0 = vmul.f32 2.0, %v2134_v58  ;;  %v2253_v2 = vsel %vm3950_vm5, %v2237_v57, 0.0  ;;  %v2155_v3 = vadd.f32 %v2876_v62, %v3879_v56 }
 0x536   : > { %vm2219_vm6 = vmand %vm2187_vm3, %vm2203_vm10  ;;  %v2146_v4 = vpop.f32.mrf.mxu1  ;;  %v2268_v15 = vpack.c.bf16 %v2253_v2, %v2252_v11 }
 0x537   : > { %v2251_v7 = vsel %vm2219_vm6, %v2235_v0, 0.0  ;;  %v2147_v36 = vadd.f32 %v3879_v56, %v2146_v4  ;;  %vm2208_vm15 = vcmp.gt.f32.partialorder %v2155_v3, 0.0  ;;  %v2240_v20 = vmul.f32 2.0, %v2155_v3 }
 0x538   : > { %v2267_v13 = vpack.c.bf16 %v2251_v7, %v2250_v6  ;;  %v2877_v14 = vpop.f32.mrf.mxu1  ;;  %vm2224_vm4 = vmand %vm2192_vm14, %vm2208_vm15 }
 0x539   : > { %vm2206_vm9 = vcmp.gt.f32.partialorder %v2147_v36, 0.0  ;;  %v2158_v16 = vadd.f32 %v2877_v14, %v3879_v56  ;;  %v2238_v18 = vmul.f32 2.0, %v2147_v36  ;;  %v2256_v26 = vsel %vm2224_vm4, %v2240_v20, 0.0 }
 0x53a   : > { %v2149_v17 = vpop.f32.mrf.mxu1  ;;  %2890 = vmatprep.mubr.msk.bf16.mxu0 %vm1035_vm12, %v2267_v13  ;;  %vm3973_vm1 = vmand %vm2190_vm7, %vm2206_vm9 }
 0x53b   : > { %vm2209_vm2 = vcmp.gt.f32.partialorder %v2158_v16, 0.0  ;;  %v2241_v19 = vmul.f32 2.0, %v2158_v16  ;;  %v2150_v47 = vadd.f32 %v3879_v56, %v2149_v17  ;;  %2891 = vmatmul.mubr.msk.bf16.gmra.mxu0 %vm1035_vm12, %v2268_v15  ;;  %v2254_v24 = vsel %vm3973_vm1, %v2238_v18, 0.0  ;;  %v2677_v56 = vld [vmem:[%s4042_s7] ss:$0 sm:$0xff] }
 0x53c   : > { %vm2225_vm3 = vmand %vm2193_vm8, %vm2209_vm2 }
 0x53d   : > { %vm2207_vm0 = vcmp.gt.f32.partialorder %v2150_v47, 0.0  ;;  %v2239_v22 = vmul.f32 2.0, %v2150_v47  ;;  %v2257_v23 = vsel %vm2225_vm3, %v2241_v19, 0.0 }
 0x53e   : > { %vm2223_vm5 = vmand %vm2191_vm11, %vm2207_vm0  ;;  %v2270_v27 = vpack.c.bf16 %v2257_v23, %v2256_v26 }
 0x53f   : > { %v2255_v25 = vsel %vm2223_vm5, %v2239_v22, 0.0 }
 0x540   : > { %v2269_v60 = vpack.c.bf16 %v2255_v25, %v2254_v24 }
 0x542   : > { %2894 = vmatprep.mubr.msk.bf16.mxu0 %vm1035_vm12, %v2269_v60 }
 0x543   : > { %2895 = vmatmul.mubr.msk.bf16.gmra.mxu0 %vm1035_vm12, %v2270_v27 }
 0x5eb   : > { %v2884_v28 = vpop.f32.mrf.mxu0 }
 0x5ec   : > { %v2356_v29 = vadd.f32 %v2884_v28, %v2677_v56 }
 0x5ed   : > { %v2347_v30 = vpop.f32.mrf.mxu0 }
 0x5ee   : > { %2413 = vst.msk [vmem:[%s3991_s18 + $0x10] sm:$0xff] %vm2410_vm13, %v2356_v29  ;;  %v2348_v31 = vadd.f32 %v2677_v56, %v2347_v30 }
 0x5ef   : > { %v2885_v32 = vpop.f32.mrf.mxu0 }
 0x5f0   : > { %2411 = vst.msk [vmem:[%s3991_s18] sm:$0xff] %vm2410_vm13, %v2348_v31  ;;  %v2359_v33 = vadd.f32 %v2885_v32, %v2677_v56 }
 0x5f1   : > { %v2350_v34 = vpop.f32.mrf.mxu0 }
 0x5f2   : > { %2414 = vst.msk [vmem:[%s3991_s18 + $0x18] sm:$0xff] %vm2410_vm13, %v2359_v33  ;;  %v2351_v35 = vadd.f32 %v2677_v56, %v2350_v34 }
 0x5f3   : > { %v2888_v37 = vpop.f32.mrf.mxu0 }
 0x5f4   : > { %2412 = vst.msk [vmem:[%s3991_s18 + $0x8] sm:$0xff] %vm2410_vm13, %v2351_v35  ;;  %v2372_v38 = vadd.f32 %v2888_v37, %v2677_v56 }
 0x5f5   : > { %v2363_v39 = vpop.f32.mrf.mxu0 }
 0x5f6   : > { %2417 = vst.msk [vmem:[%s3991_s18 + $0x30] sm:$0xff] %vm2410_vm13, %v2372_v38  ;;  %v2364_v40 = vadd.f32 %v2677_v56, %v2363_v39 }
 0x5f7   : > { %v2889_v41 = vpop.f32.mrf.mxu0 }
 0x5f8   : > { %2415 = vst.msk [vmem:[%s3991_s18 + $0x20] sm:$0xff] %vm2410_vm13, %v2364_v40  ;;  %v2375_v42 = vadd.f32 %v2889_v41, %v2677_v56 }
 0x5f9   : > { %v2366_v43 = vpop.f32.mrf.mxu0 }
 0x5fa   : > { %2418 = vst.msk [vmem:[%s3991_s18 + $0x38] sm:$0xff] %vm2410_vm13, %v2375_v42  ;;  %v2367_v44 = vadd.f32 %v2677_v56, %v2366_v43 }
 0x5fb   : > { %v2892_v45 = vpop.f32.mrf.mxu0 }
 0x5fc   : > { %2416 = vst.msk [vmem:[%s3991_s18 + $0x28] sm:$0xff] %vm2410_vm13, %v2367_v44  ;;  %v2388_v10 = vadd.f32 %v2892_v45, %v2677_v56 }
 0x5fd   : > { %v2379_v46 = vpop.f32.mrf.mxu0 }
 0x5fe   : > { %2421 = vst.msk [vmem:[%s3991_s18 + $0x50] sm:$0xff] %vm2410_vm13, %v2388_v10  ;;  %v2380_v48 = vadd.f32 %v2677_v56, %v2379_v46 }
 0x5ff   : > { %v2893_v49 = vpop.f32.mrf.mxu0 }
 0x600   : > { %2419 = vst.msk [vmem:[%s3991_s18 + $0x40] sm:$0xff] %vm2410_vm13, %v2380_v48  ;;  %v2391_v50 = vadd.f32 %v2893_v49, %v2677_v56 }
 0x601   : > { %v2382_v51 = vpop.f32.mrf.mxu0 }
 0x602   : > { %2422 = vst.msk [vmem:[%s3991_s18 + $0x58] sm:$0xff] %vm2410_vm13, %v2391_v50  ;;  %v2383_v52 = vadd.f32 %v2677_v56, %v2382_v51 }
 0x603   : > { %v2896_v53 = vpop.f32.mrf.mxu0 }
 0x604   : > { %2420 = vst.msk [vmem:[%s3991_s18 + $0x48] sm:$0xff] %vm2410_vm13, %v2383_v52  ;;  %v2404_v54 = vadd.f32 %v2896_v53, %v2677_v56 }
 0x605   : > { %v2395_v55 = vpop.f32.mrf.mxu0 }
 0x606   : > { %2425 = vst.msk [vmem:[%s3991_s18 + $0x70] sm:$0xff] %vm2410_vm13, %v2404_v54  ;;  %v2396_v21 = vadd.f32 %v2677_v56, %v2395_v55 }
 0x607   : > { %v2897_v57 = vpop.f32.mrf.mxu0 }
 0x608   : > { %2423 = vst.msk [vmem:[%s3991_s18 + $0x60] sm:$0xff] %vm2410_vm13, %v2396_v21  ;;  %v2407_v58 = vadd.f32 %v2897_v57, %v2677_v56 }
 0x609   : > { %v2398_v59 = vpop.f32.mrf.mxu0 }
 0x60a   : > { %2426 = vst.msk [vmem:[%s3991_s18 + $0x78] sm:$0xff] %vm2410_vm13, %v2407_v58  ;;  %v2399_v61 = vadd.f32 %v2677_v56, %v2398_v59 }
 0x60c   : > { %2424 = vst.msk [vmem:[%s3991_s18 + $0x68] sm:$0xff] %vm2410_vm13, %v2399_v61 }
 0x60d PF: > { %p15_p9 = scmp.ge.s32.totalorder %s3025_s9, 4   ;;  %s4168_s27 = smov %s2957_s28 }
 0x60e   : > { %s4169_s28 = smov %s3034_s12  ;;  %s4170_s29 = smov %s3025_s9 }
 0x60f   :  { %17 = sbr.rel (!%p15_p9) target bundleno = 2 (0x2), region = 141 }

</bundles_post_ra>
